<compile_context>
chip_gen: v6e
topology: v6e:2x2x1
jax: 0.10.0
libtpu: 0.0.40
codegen_flags: <defaults>
</compile_context>

<pallas_src>
import jax
import jax.numpy as jnp
from jax.experimental import pallas as pl
from jax.experimental.pallas import tpu as pltpu

IN_DIM = 1280
H1_DIM = 512
H2_DIM = 64          # logical fc2 out_features (PyTorch)
H2_PAD = 128         # lane-dense padded width
LANE = 128


def _round_up(x, m):
    return (x + m - 1) // m * m


def _mlp_kernel(x_ref, w1_ref, b1_ref, w2_ref, b2_ref, w3_ref, b3_ref, o_ref):
    # fc1 + ReLU  (bf16 operands, f32 MXU accumulation)
    h1 = jnp.dot(x_ref[...], w1_ref[...], preferred_element_type=jnp.float32)
    h1 = jnp.maximum(h1 + b1_ref[...], 0.0)
    # Dropout(0.2) == identity in eval mode.
    # fc2 + ReLU
    h2 = jnp.dot(h1.astype(jnp.bfloat16), w2_ref[...],
                 preferred_element_type=jnp.float32)
    h2 = jnp.maximum(h2 + b2_ref[...], 0.0)
    # fc3 (logits, no activation)
    out = jnp.dot(h2.astype(jnp.bfloat16), w3_ref[...],
                  preferred_element_type=jnp.float32) + b3_ref[...]
    o_ref[...] = out.astype(o_ref.dtype)


def llm_classifier_forward(x, params, out_dim, *, block_b=256):
    """x: (B, 1280) float32 (cast to bf16 internally). params: prepared/padded dict."""
    B, D = x.shape
    assert D == IN_DIM
    out_pad = params["w3"].shape[1]

    # Clamp the batch tile for tiny batches; keep it a multiple of 8 (sublane).
    block_b = max(8, min(block_b, _round_up(B, 8)))
    block_b = _round_up(block_b, 8)
    B_pad = _round_up(B, block_b)
    grid = (B_pad // block_b,)

    x_p = x.astype(jnp.bfloat16)
    if B_pad != B:
        x_p = jnp.pad(x_p, ((0, B_pad - B), (0, 0)))

    def const2d(shape):  # weights/biases: fully resident, constant block index
        return pl.BlockSpec(shape, lambda i: (0, 0))

    flops = 2 * B_pad * (IN_DIM * H1_DIM + H1_DIM * H2_PAD + H2_PAD * out_pad)
    bytes_accessed = (
        x_p.size * x_p.dtype.itemsize
        + sum(params[k].size * params[k].dtype.itemsize
              for k in ("w1", "b1", "w2", "b2", "w3", "b3"))
        + B_pad * out_pad * 4
    )

    out = pl.pallas_call(
        _mlp_kernel,
        out_shape=jax.ShapeDtypeStruct((B_pad, out_pad), jnp.float32),
        grid_spec=pltpu.PrefetchScalarGridSpec(
            num_scalar_prefetch=0,
            grid=grid,
            in_specs=[
                pl.BlockSpec((block_b, IN_DIM), lambda i: (i, 0)),   # x tile
                const2d((IN_DIM, H1_DIM)),                           # w1 (bf16)
                const2d((1, H1_DIM)),                                # b1 (f32)
                const2d((H1_DIM, H2_PAD)),                           # w2 (bf16, padded)
                const2d((1, H2_PAD)),                                # b2 (f32, padded w/ 0)
                const2d((H2_PAD, out_pad)),                          # w3 (bf16, padded)
                const2d((1, out_pad)),                               # b3 (f32, padded w/ 0)
            ],
            out_specs=pl.BlockSpec((block_b, out_pad), lambda i: (i, 0)),
        ),
        compiler_params=pltpu.CompilerParams(
            dimension_semantics=("parallel",),      # megacore sharding on v7x
            vmem_limit_bytes=32 * 1024 * 1024,      # headroom for large batch tiles
        ),
        cost_estimate=pl.CostEstimate(
            flops=flops, transcendentals=0, bytes_accessed=bytes_accessed),
    )(x_p, params["w1"], params["b1"], params["w2"], params["b2"],
      params["w3"], params["b3"])

    return out[:B, :out_dim]


def init_params(key, output_dim):
    """Deterministic init mirroring nn.Linear (stored transposed: (in, out)), float32."""
    k1, k2, k3, k4, k5, k6 = jax.random.split(key, 6)

    def lin(kw, kb, fan_in, fan_out):
        bound = 1.0 / jnp.sqrt(fan_in)
        w = jax.random.uniform(kw, (fan_in, fan_out), jnp.float32, -bound, bound)
        b = jax.random.uniform(kb, (1, fan_out), jnp.float32, -bound, bound)
        return w, b

    w1, b1 = lin(k1, k2, IN_DIM, H1_DIM)
    w2, b2 = lin(k3, k4, H1_DIM, H2_DIM)
    w3, b3 = lin(k5, k6, H2_DIM, output_dim)
    return {"w1": w1, "b1": b1, "w2": w2, "b2": b2, "w3": w3, "b3": b3}


def prepare_params(p, output_dim):
    """Zero-pad narrow dims to lane width and cast weights to bf16 (biases stay f32)."""
    out_pad = max(LANE, _round_up(output_dim, LANE))
    w2 = jnp.pad(p["w2"], ((0, 0), (0, H2_PAD - H2_DIM)))
    b2 = jnp.pad(p["b2"], ((0, 0), (0, H2_PAD - H2_DIM)))
    w3 = jnp.pad(p["w3"], ((0, H2_PAD - H2_DIM), (0, out_pad - output_dim)))
    b3 = jnp.pad(p["b3"], ((0, 0), (0, out_pad - output_dim)))
    return {
        "w1": p["w1"].astype(jnp.bfloat16),
        "b1": p["b1"].astype(jnp.float32),
        "w2": w2.astype(jnp.bfloat16),
        "b2": b2.astype(jnp.float32),
        "w3": w3.astype(jnp.bfloat16),
        "b3": b3.astype(jnp.float32),
    }


def reference_forward(x, p):
    """Pure-JAX reference on the ORIGINAL (unpadded, f32) params, mirroring kernel dtypes."""
    h1 = jnp.dot(x.astype(jnp.bfloat16), p["w1"].astype(jnp.bfloat16),
                 preferred_element_type=jnp.float32)
    h1 = jnp.maximum(h1 + p["b1"], 0.0)
    h2 = jnp.dot(h1.astype(jnp.bfloat16), p["w2"].astype(jnp.bfloat16),
                 preferred_element_type=jnp.float32)
    h2 = jnp.maximum(h2 + p["b2"], 0.0)
    return jnp.dot(h2.astype(jnp.bfloat16), p["w3"].astype(jnp.bfloat16),
                   preferred_element_type=jnp.float32) + p["b3"]


if __name__ == "__main__":
    key = jax.random.PRNGKey(0)
    kx, kp = jax.random.split(key)

    B = 40            # deliberately NOT a multiple of the tile -> exercises batch padding
    OUTPUT_DIM = 8

    x = jax.random.normal(kx, (B, IN_DIM), jnp.float32)
    raw_params = init_params(kp, OUTPUT_DIM)
    params = prepare_params(raw_params, OUTPUT_DIM)

    # Small block_b for the tiny test batch (multi-tile grid: 48/16 = 3 steps).
    out = llm_classifier_forward(x, params, OUTPUT_DIM, block_b=16)
    out = jax.block_until_ready(out)

    ref = reference_forward(x, raw_params)
    assert out.shape == (B, OUTPUT_DIM)
    max_err = float(jnp.max(jnp.abs(out - ref)))
    assert jnp.allclose(out, ref, atol=2e-2, rtol=2e-2), f"mismatch vs reference (max abs err={max_err})"

    print("KERNEL_OK")
</pallas_src>

<mosaic_0001>
module attributes {stable_mosaic.version = 11 : i64} {
  func.func @_mlp_kernel(%arg0: i32, %arg1: memref<16x1280xbf16, #tpu.memory_space<vmem>>, %arg2: memref<1280x512xbf16, #tpu.memory_space<vmem>>, %arg3: memref<1x512xf32, #tpu.memory_space<vmem>>, %arg4: memref<512x128xbf16, #tpu.memory_space<vmem>>, %arg5: memref<1x128xf32, #tpu.memory_space<vmem>>, %arg6: memref<128x128xbf16, #tpu.memory_space<vmem>>, %arg7: memref<1x128xf32, #tpu.memory_space<vmem>>, %arg8: memref<16x128xf32, #tpu.memory_space<vmem>>) attributes {dimension_semantics = [#tpu.dimension_semantics<parallel>], iteration_bounds = array<i64: 3>, scalar_prefetch = 0 : i64, scratch_operands = 0 : i64, tpu.core_type = #tpu.core_type<tc>, window_params = [{transform_indices = @transform_0, window_bounds = array<i64: 16, 1280>}, {pipeline_mode = #tpu.pipeline_mode<synchronous>, transform_indices = @transform_1, window_bounds = array<i64: 1280, 512>}, {pipeline_mode = #tpu.pipeline_mode<synchronous>, transform_indices = @transform_2, window_bounds = array<i64: 1, 512>}, {pipeline_mode = #tpu.pipeline_mode<synchronous>, transform_indices = @transform_3, window_bounds = array<i64: 512, 128>}, {pipeline_mode = #tpu.pipeline_mode<synchronous>, transform_indices = @transform_4, window_bounds = array<i64: 1, 128>}, {pipeline_mode = #tpu.pipeline_mode<synchronous>, transform_indices = @transform_5, window_bounds = array<i64: 128, 128>}, {pipeline_mode = #tpu.pipeline_mode<synchronous>, transform_indices = @transform_6, window_bounds = array<i64: 1, 128>}, {transform_indices = @transform_7, window_bounds = array<i64: 16, 128>}]} {
    %c0 = arith.constant 0 : index
    %c0_0 = arith.constant 0 : index
    %0 = vector.load %arg1[%c0, %c0_0] : memref<16x1280xbf16, #tpu.memory_space<vmem>>, vector<16x1280xbf16>
    %c0_1 = arith.constant 0 : index
    %c0_2 = arith.constant 0 : index
    %1 = vector.load %arg2[%c0_1, %c0_2] : memref<1280x512xbf16, #tpu.memory_space<vmem>>, vector<1280x512xbf16>
    %cst = arith.constant dense<0.000000e+00> : vector<16x512xf32>
    %2 = tpu.matmul %0, %1, %cst {dimension_numbers = #tpu.dot_dimension_numbers<[1], [0], [0], [1], [0, 0, 1, 1], [], []>} : vector<16x1280xbf16>, vector<1280x512xbf16>, vector<16x512xf32> -> vector<16x512xf32>
    %c0_3 = arith.constant 0 : index
    %c0_4 = arith.constant 0 : index
    %3 = vector.load %arg3[%c0_3, %c0_4] : memref<1x512xf32, #tpu.memory_space<vmem>>, vector<1x512xf32>
    %4 = vector.broadcast %3 : vector<1x512xf32> to vector<16x512xf32>
    %5 = arith.addf %2, %4 : vector<16x512xf32>
    %cst_5 = arith.constant 0.000000e+00 : f32
    %6 = vector.broadcast %cst_5 : f32 to vector<16x512xf32>
    %7 = arith.maximumf %5, %6 : vector<16x512xf32>
    %8 = arith.truncf %7 : vector<16x512xf32> to vector<16x512xbf16>
    %c0_6 = arith.constant 0 : index
    %c0_7 = arith.constant 0 : index
    %9 = vector.load %arg4[%c0_6, %c0_7] : memref<512x128xbf16, #tpu.memory_space<vmem>>, vector<512x128xbf16>
    %cst_8 = arith.constant dense<0.000000e+00> : vector<16x128xf32>
    %10 = tpu.matmul %8, %9, %cst_8 {dimension_numbers = #tpu.dot_dimension_numbers<[1], [0], [0], [1], [0, 0, 1, 1], [], []>} : vector<16x512xbf16>, vector<512x128xbf16>, vector<16x128xf32> -> vector<16x128xf32>
    %c0_9 = arith.constant 0 : index
    %c0_10 = arith.constant 0 : index
    %11 = vector.load %arg5[%c0_9, %c0_10] : memref<1x128xf32, #tpu.memory_space<vmem>>, vector<1x128xf32>
    %12 = vector.broadcast %11 : vector<1x128xf32> to vector<16x128xf32>
    %13 = arith.addf %10, %12 : vector<16x128xf32>
    %cst_11 = arith.constant 0.000000e+00 : f32
    %14 = vector.broadcast %cst_11 : f32 to vector<16x128xf32>
    %15 = arith.maximumf %13, %14 : vector<16x128xf32>
    %16 = arith.truncf %15 : vector<16x128xf32> to vector<16x128xbf16>
    %c0_12 = arith.constant 0 : index
    %c0_13 = arith.constant 0 : index
    %17 = vector.load %arg6[%c0_12, %c0_13] : memref<128x128xbf16, #tpu.memory_space<vmem>>, vector<128x128xbf16>
    %cst_14 = arith.constant dense<0.000000e+00> : vector<16x128xf32>
    %18 = tpu.matmul %16, %17, %cst_14 {dimension_numbers = #tpu.dot_dimension_numbers<[1], [0], [0], [1], [0, 0, 1, 1], [], []>} : vector<16x128xbf16>, vector<128x128xbf16>, vector<16x128xf32> -> vector<16x128xf32>
    %c0_15 = arith.constant 0 : index
    %c0_16 = arith.constant 0 : index
    %19 = vector.load %arg7[%c0_15, %c0_16] : memref<1x128xf32, #tpu.memory_space<vmem>>, vector<1x128xf32>
    %20 = vector.broadcast %19 : vector<1x128xf32> to vector<16x128xf32>
    %21 = arith.addf %18, %20 : vector<16x128xf32>
    %c0_17 = arith.constant 0 : index
    %c0_18 = arith.constant 0 : index
    %22 = vector.load %arg8[%c0_17, %c0_18] : memref<16x128xf32, #tpu.memory_space<vmem>>, vector<16x128xf32>
    tpu.vector_store %arg8[%c0_17, %c0_18], %21 {strides = array<i32>} : memref<16x128xf32, #tpu.memory_space<vmem>>, vector<16x128xf32>,
    return
  }
  func.func @transform_0(%arg0: i32) -> (i32, i32) {
    %c0_i32 = arith.constant 0 : i32
    %c0_i32_0 = arith.constant 0 : i32
    return %arg0, %c0_i32 : i32, i32
  }
  func.func @transform_1(%arg0: i32) -> (i32, i32) {
    %c0_i32 = arith.constant 0 : i32
    %c0_i32_0 = arith.constant 0 : i32
    %c0_i32_1 = arith.constant 0 : i32
    return %c0_i32, %c0_i32_0 : i32, i32
  }
  func.func @transform_2(%arg0: i32) -> (i32, i32) {
    %c0_i32 = arith.constant 0 : i32
    %c0_i32_0 = arith.constant 0 : i32
    %c0_i32_1 = arith.constant 0 : i32
    return %c0_i32, %c0_i32_0 : i32, i32
  }
  func.func @transform_3(%arg0: i32) -> (i32, i32) {
    %c0_i32 = arith.constant 0 : i32
    %c0_i32_0 = arith.constant 0 : i32
    %c0_i32_1 = arith.constant 0 : i32
    return %c0_i32, %c0_i32_0 : i32, i32
  }
  func.func @transform_4(%arg0: i32) -> (i32, i32) {
    %c0_i32 = arith.constant 0 : i32
    %c0_i32_0 = arith.constant 0 : i32
    %c0_i32_1 = arith.constant 0 : i32
    return %c0_i32, %c0_i32_0 : i32, i32
  }
  func.func @transform_5(%arg0: i32) -> (i32, i32) {
    %c0_i32 = arith.constant 0 : i32
    %c0_i32_0 = arith.constant 0 : i32
    %c0_i32_1 = arith.constant 0 : i32
    return %c0_i32, %c0_i32_0 : i32, i32
  }
  func.func @transform_6(%arg0: i32) -> (i32, i32) {
    %c0_i32 = arith.constant 0 : i32
    %c0_i32_0 = arith.constant 0 : i32
    %c0_i32_1 = arith.constant 0 : i32
    return %c0_i32, %c0_i32_0 : i32, i32
  }
  func.func @transform_7(%arg0: i32) -> (i32, i32) {
    %c0_i32 = arith.constant 0 : i32
    %c0_i32_0 = arith.constant 0 : i32
    return %arg0, %c0_i32 : i32, i32
  }
}

</mosaic_0001>

<bundles_post_ra>
// kernel: tpu_custom_call.1
= control target key start
LH: loop header
LB: loop body
LE: loop exit
PB: predicated region body
PF: predicated region fallthrough
CT: control target
= control target key end

     0   :  { %s5176_s0 = inlined_call_operand.hbm [shape: bf16[48,1280], index: 0, kind: input, shape index: {}]   ;;  %s5177_s1 = inlined_call_operand.hbm [shape: bf16[1280,512], index: 1, kind: input, shape index: {}]   ;;  %s5178_s2 = inlined_call_operand.hbm [shape: f32[1,512], index: 2, kind: input, shape index: {}]   ;;  %s5179_s3 = inlined_call_operand.hbm [shape: bf16[512,128], index: 3, kind: input, shape index: {}]   ;;  %s5180_s4 = inlined_call_operand.hbm [shape: f32[1,128], index: 4, kind: input, shape index: {}]   ;;  %s5181_s5 = inlined_call_operand.hbm [shape: bf16[128,128], index: 5, kind: input, shape index: {}]   ;;  %s5182_s6 = inlined_call_operand.hbm [shape: f32[1,128], index: 6, kind: input, shape index: {}]   ;;  %s5183_s7 = inlined_call_operand.hbm [shape: f32[48,128], index: 7, kind: output, shape index: {}]  }
   0x1   :  { %5188 = sst [smem:[#allocation20_spill]] %s5177_s1 }
   0x2   :  { %12 = vsyncpa [#allocation3], 0 }
   0x3   :  { %14 = vsyncpa [#allocation3 + $0x1], 0 }
   0x4   :  { %15 = vsyncpa [#allocation6], 0 }
   0x5   :  { %16 = vsyncpa [#allocation9], 0 }
   0x6   :  { %17 = vsyncpa [#allocation12], 0 }
   0x7   :  { %18 = vsyncpa [#allocation4], 0 }
   0x8   :  { %20 = vsyncpa [#allocation4 + $0x1], 0  ;;  %s4882_s24 = smov 0   ;;  %s4884_s25 = smov 0  }
   0x9   :  { %s4886_s26 = smov 0   ;;  %s4888_s27 = smov 0  }
   0xa LB: > { %s4824_s28 = smov [#allocation5]   ;;  %s4903_s30 = sadd.s32 4294967295, %s4822_s27   ;;  %s4822_s27 = sphi %s4888_s27, %s5211_s27   ;;  %s4818_s26 = sphi %s4886_s26, %s5210_s26   ;;  %s4814_s25 = sphi %s4884_s25, %s5209_s25   ;;  %s4810_s24 = sphi %s4882_s24, %s5208_s24  }
   0xb   : > { %s221_s29 = sshll.u32 %s4824_s28, 4  ;;  %p3433_p0 = scmp.ge.s32.totalorder %s4822_s27, 1  ;;  %s222_s29 = int_to_ptr.vmem [resolvable:$true] %s221_s29 }
   0xc   : > { %p5184_p1 = scmp.eq.s32.totalorder %s4903_s30, 0  ;;  %p209_p2 = scmp.lt.s32.totalorder %s4822_s27, 4 }
   0xd   : > { %s4825_s9 = smov [#allocation8]   ;;  %s4826_s12 = smov [#allocation11]  }
   0xe   : > { %p4908_p3 = pnand %p3433_p0, %p209_p2  ;;  %s245_s10 = sshll.u32 %s4825_s9, 4  ;;  %s4920_s10 = int_to_ptr.vmem [resolvable:$true] %s245_s10 }
   0xf   : > { %s4922_s13 = sshll.u32 %s4826_s12, 4  ;;  %s4573_s15 = scalar_lea.vmem %s222_s29, 40960  ;;  %s270_s13 = int_to_ptr.vmem [resolvable:$true] %s4922_s13 }
  0x10   : > { %s5189_s8 = scalar_select %p4908_p3, 1, 0 }
  0x11   : > { %p3934_p4 = pneg %p4908_p3  ;;  %p4574_p7 = scmp.ne.s32.totalorder %s222_s29, %s4573_s15 }
  0x12   : > { %p4581_p10 = scmp.lt.s32.totalorder %s222_s29, %s222_s29  ;;  %p4582_p11 = scmp.lt.s32.totalorder %s4573_s15, %s4573_s15 }
  0x13   : > { %p4916_p5 = pnand %p3934_p4, %p5184_p1 }
  0x14   : > { %p4583_p12 = por %p4582_p11, %p4581_p10 }
  0x15   : > { %p4926_p6 = pneg %p4916_p5 }
  0x17   : > { %p4576_p8 = pnand %p4574_p7, %p4926_p6 }
  0x19   : > { %p4577_p9 = pneg %p4576_p8 }
  0x1b   : > { %p4584_p13 = pnand %p4583_p12, %p4577_p9 }
  0x1d   : > { %4587 = shalt.err (!%p4584_p13)
}
  0x1e   : > { %s4827_s16 = smov 256   ;;  %s4828_s17 = smov 16  }
  0x1f   : > { %s5192_s1 = sld [smem:[#allocation20_spill]]  ;;  %s4599_s20 = scalar_lea.vmem %s4920_s10, 4096 }
  0x20   : > { %p4600_p0 = scmp.ne.s32.totalorder %s4920_s10, %s4599_s20  ;;  %p4607_p7 = scmp.lt.s32.totalorder %s4920_s10, %s4920_s10 }
  0x21   : > { %p4608_p8 = scmp.lt.s32.totalorder %s4599_s20, %s4599_s20 }
  0x22   : > { %p4602_p2 = pnand %p4600_p0, %p4926_p6 }
  0x23   : > { %p4609_p9 = por %p4608_p8, %p4607_p7 }
  0x24   : > { %p4603_p4 = pneg %p4602_p2 }
  0x25   : > { %3937 = dma.hbm_to_vmem [thread:$0]  (!%p4916_p5), %s5192_s1, 40960, %s222_s29, [#allocation6], %s4827_s16, %s4827_s16, %s4828_s17  }
  0x26   : > { %p4610_p10 = pnand %p4609_p9, %p4603_p4 }
  0x28   : > { %4613 = shalt.err (!%p4610_p10)
}
  0x29   : > { %s4829_s21 = smov 64   ;;  %s4830_s22 = smov 4  }
  0x2a   : > { %3943 = dma.hbm_to_vmem [thread:$0]  (!%p4916_p5), %s5179_s3, 4096, %s4920_s10, [#allocation9], %s4829_s21, %s4829_s21, %s4830_s22  }
  0x2b   : > { %s4625_s29 = scalar_lea.vmem %s270_s13, 1024  ;;  %p4633_p0 = scmp.lt.s32.totalorder %s270_s13, %s270_s13 }
  0x2c   : > { %p4626_p11 = scmp.ne.s32.totalorder %s270_s13, %s4625_s29  ;;  %p4634_p2 = scmp.lt.s32.totalorder %s4625_s29, %s4625_s29 }
  0x2e   : > { %p4628_p12 = pnand %p4626_p11, %p4926_p6  ;;  %p4635_p4 = por %p4634_p2, %p4633_p0 }
  0x30   : > { %p4629_p13 = pneg %p4628_p12 }
  0x32   : > { %p4636_p7 = pnand %p4635_p4, %p4629_p13 }
  0x34   : > { %4639 = shalt.err (!%p4636_p7)
}
  0x35   : > { %3949 = dma.hbm_to_vmem [thread:$0]  (!%p4916_p5), %s5181_s5, 1024, %s270_s13, [#allocation12], %s4829_s21, %s4829_s21, %s4830_s22  }
  0x36   : > { %s4831_s15 = smov [#allocation7]   ;;  %s4832_s16 = smov [#allocation10]  }
  0x37   : > { %s235_s10 = sshll.u32 %s4831_s15, 4  ;;  %s259_s17 = sshll.u32 %s4832_s16, 4  ;;  %s236_s10 = int_to_ptr.vmem [resolvable:$true] %s235_s10  ;;  %s260_s17 = int_to_ptr.vmem [resolvable:$true] %s259_s17 }
  0x38   : > { %s4651_s18 = scalar_lea.vmem %s236_s10, 64  ;;  %p4659_p11 = scmp.lt.s32.totalorder %s236_s10, %s236_s10 }
  0x39   : > { %p4652_p8 = scmp.ne.s32.totalorder %s236_s10, %s4651_s18  ;;  %p4660_p12 = scmp.lt.s32.totalorder %s4651_s18, %s4651_s18 }
  0x3b   : > { %p4654_p9 = pnand %p4652_p8, %p4926_p6  ;;  %p4661_p13 = por %p4660_p12, %p4659_p11 }
  0x3d   : > { %p4655_p10 = pneg %p4654_p9 }
  0x3f   : > { %p4662_p0 = pnand %p4661_p13, %p4655_p10 }
  0x41   : > { %4665 = shalt.err (!%p4662_p0)
}
  0x42   : > { %3940 = dma.hbm_to_vmem [thread:$0]  (!%p4916_p5), %s5178_s2, 64, %s236_s10, [#allocation6]  }
  0x43   : > { %s4677_s13 = scalar_lea.vmem %s260_s17, 16  ;;  %s4684_s21 = scalar_lea.vmem %s260_s17, 32 }
  0x44   : > { %p4678_p2 = scmp.ne.s32.totalorder %s260_s17, %s4677_s13  ;;  %p4685_p8 = scmp.lt.s32.totalorder %s260_s17, %s260_s17 }
  0x45   : > { %p4686_p9 = scmp.lt.s32.totalorder %s4684_s21, %s4677_s13 }
  0x46   : > { %p4680_p4 = pnand %p4678_p2, %p4926_p6 }
  0x47   : > { %p4687_p1 = por %p4686_p9, %p4685_p8 }
  0x48   : > { %p4681_p7 = pneg %p4680_p4 }
  0x4a   : > { %p4688_p11 = pnand %p4687_p1, %p4681_p7 }
  0x4c   : > { %4691 = shalt.err (!%p4688_p11)
}
  0x4d   : > { %3946 = dma.hbm_to_vmem [thread:$0]  (!%p4916_p5), %s5180_s4, 16, %s260_s17, [#allocation9]  }
  0x4e   : > { %s4833_s28 = smov [#allocation13]  }
  0x4f   : > { %s283_s29 = sshll.u32 %s4833_s28, 4  ;;  %s284_s29 = int_to_ptr.vmem [resolvable:$true] %s283_s29 }
  0x50   : > { %s4703_s9 = scalar_lea.vmem %s284_s29, 16  ;;  %s4710_s12 = scalar_lea.vmem %s284_s29, 32 }
  0x51   : > { %p4704_p10 = scmp.ne.s32.totalorder %s284_s29, %s4703_s9  ;;  %p4711_p0 = scmp.lt.s32.totalorder %s284_s29, %s284_s29 }
  0x52   : > { %p4712_p2 = scmp.lt.s32.totalorder %s4710_s12, %s4703_s9 }
  0x53   : > { %p4706_p12 = pnand %p4704_p10, %p4926_p6 }
  0x54   : > { %p4713_p1 = por %p4712_p2, %p4711_p0 }
  0x55   : > { %p4707_p13 = pneg %p4706_p12 }
  0x57   : > { %p4714_p4 = pnand %p4713_p1, %p4707_p13 }
  0x59   : > { %4717 = shalt.err (!%p4714_p4)
}
  0x5a   : > { %3952 = dma.hbm_to_vmem [thread:$0]  (!%p4916_p5), %s5182_s6, 16, %s284_s29, [#allocation12]  }
  0x5b   : > { %s3432_s14 = sadd.s32 4294967294, %s4822_s27   ;;  %s4980_s11 = sadd.s32 1, %s4822_s27  }
  0x5c   : > { %s30_s16 = ssub.s32 %s4822_s27, %s4980_s11  ;;  %s33_s17 = sadd.s32 1, %s4818_s26 }
  0x5d   : > { %p31_p6 = scmp.eq.s32.totalorder %s30_s16, 0  ;;  %p40_p7 = scmp.ne.s32.totalorder %s4818_s26, %s4814_s25 }
  0x5e   : > { %p41_p8 = scmp.eq.s32.totalorder %s4822_s27, 0  ;;  %p46_p9 = scmp.ne.s32.totalorder %s4814_s25, %s4810_s24 }
  0x5f   : > { %s4991_s18 = scalar_select %p31_p6, %s4818_s26, %s33_s17  }
  0x60   : > { %p42_p11 = por %p41_p8, %p40_p7  ;;  %p5193_p10 = scmp.eq.s32.totalorder %s4903_s30, 0 }
  0x61   : > { %p196_p5 = scmp.eq.s32.totalorder %s4903_s30, 2  ;;  %p202_p13 = scmp.eq.s32.totalorder %s3432_s14, 2 }
  0x62   : > { %p4995_p12 = por %p5193_p10, %p46_p9  ;;  %p3967_p0 = scmp.lt.s32.totalorder %s4822_s27, 3 }
  0x63   : > { %s294_s20 = sand.u32 1, %s4818_s26   ;;  %p5002_p2 = por %p196_p5, %p40_p7 }
  0x64   : > { %s5194_s19 = scalar_select %p4995_p12, 1, 0 }
  0x65   : > { %s5195_s13 = scalar_select %p5002_p2, 1, 0 }
  0x66   : > { %p5006_p1 = por %p202_p13, %p46_p9  ;;  %s3903_s22 = smul.u32 80, %s294_s20 }
  0x67   : > { %s3904_s23 = smul.u32 1280, %s4822_s27  ;;  %p5011_p4 = pnand %p3967_p0, %p42_p11 }
  0x68   : > { %s5196_s21 = scalar_select %p5006_p1, 1, 0 }
  0x69   : > { %s5018_s12 = scalar_lea.hbm %s5176_s0, %s3904_s23  ;;  %s298_s15 = scalar_lea.vmem [#allocation2], %s3903_s22 }
  0x6a   : > { %s306_s10 = sshll.u32 %s298_s15, 4  ;;  %s5022_s14 = scalar_lea.sflag [#allocation3], %s294_s20  ;;  %s5020_s10 = int_to_ptr.vmem [resolvable:$true] %s306_s10 }
  0x6b   : > { %s4718_s16 = scalar_lea.hbm %s5018_s12, 1280  ;;  %p4720_p7 = pneg %p5011_p4 }
  0x6c   : > { %p4719_p6 = scmp.ne.s32.totalorder %s5018_s12, %s4718_s16  ;;  %s4723_s23 = scalar_lea.hbm %s5176_s0, 3840 }
  0x6d   : > { %p4724_p11 = scmp.lt.s32.totalorder %s5018_s12, %s5176_s0  ;;  %p4725_p10 = scmp.lt.s32.totalorder %s4723_s23, %s4718_s16 }
  0x6e   : > { %p4721_p8 = pnand %p4720_p7, %p4719_p6 }
  0x6f   : > { %p4726_p5 = por %p4725_p10, %p4724_p11 }
  0x70   : > { %p4722_p9 = pneg %p4721_p8 }
  0x72   : > { %p4727_p13 = pnand %p4726_p5, %p4722_p9 }
  0x74   : > { %4730 = shalt.err (!%p4727_p13)
}
  0x75   : > { %s4731_s20 = scalar_lea.vmem %s5020_s10, 1280  ;;  %s4834_s22 = smov [#allocation2]  }
  0x76   : > { %p4732_p0 = scmp.ne.s32.totalorder %s5020_s10, %s4731_s20  ;;  %s4736_s15 = sshll.u32 %s4834_s22, 4  ;;  %s4737_s15 = int_to_ptr.vmem [resolvable:$false] %s4736_s15 }
  0x77   : > { %s4738_s17 = scalar_lea.vmem %s4737_s15, 2560  ;;  %p4739_p8 = scmp.lt.s32.totalorder %s5020_s10, %s4737_s15 }
  0x78   : > { %p4734_p1 = pnand %p4732_p0, %p4720_p7  ;;  %p4740_p2 = scmp.lt.s32.totalorder %s4738_s17, %s4731_s20 }
  0x7a   : > { %p4735_p6 = pneg %p4734_p1  ;;  %p4741_p12 = por %p4740_p2, %p4739_p8 }
  0x7c   : > { %p4742_p3 = pnand %p4741_p12, %p4735_p6 }
  0x7e   : > { %4745 = shalt.err (!%p4742_p3)
}
  0x7f   : > { %s4835_s1 = smov 640   ;;  %s4836_s16 = smov 40  }
  0x80   : > { %3956 = dma.hbm_to_vmem [thread:$0]  (!%p5011_p4), %s5018_s12, 1280, %s5020_s10, %s5022_s14, %s4835_s1, %s4835_s1, %s4836_s16  }
  0x81   : > { %p5198_p7 = scmp.ne.s32.totalorder %s5189_s8, 0 }
  0x82   : > { %s5046_s29 = sand.u32 (!%p5198_p7), 1, %s4814_s25   ;;  %p5199_p3 = scmp.ne.s32.totalorder (!%p5198_p7), %s5194_s19, 0 }
  0x83   : > { %318 = sbr.rel (%p5198_p7) target bundleno = 1096 (0x448), region = 48  ;;  %s321_s9 = scalar_lea.sflag (!%p5198_p7), [#allocation3], %s5046_s29 }
  0x84   : > { %s3905_s23 = smul.u32 (!%p5198_p7), 80, %s5046_s29 }
  0x86   : > { %s5050_s20 = scalar_lea.vmem (!%p5198_p7), [#allocation2], %s3905_s23 }
  0x88   : > { %4789 = dma.done.wait (%p5199_p3), %s321_s9, 1280  }
  0x89   : > { %4791 = vsyncadd (%p5199_p3), %s321_s9, 4294966016  ;;  %p5200_p12 = scmp.eq.s32.totalorder %s4903_s30, 0 }
  0x8b   : > { %4793 = dma.done.wait (%p5200_p12), [#allocation6], 41024   ;;  %p5201_p2 = pmov %p5200_p12 }
  0x8d   : > { %4795 = vsyncadd (%p5201_p2), [#allocation6], 4294926272  ;;  %p5202_p1 = pmov %p5201_p2 }
  0x8f   : > { %4797 = dma.done.wait (%p5202_p1), [#allocation9], 4112   ;;  %p5203_p4 = pmov %p5202_p1 }
  0x90   : > { %p5204_p9 = pmov %p5202_p1 }
  0x91   : > { %4799 = vsyncadd (%p5203_p4), [#allocation9], 4294963184 }
  0x92   : > { %4801 = dma.done.wait (%p5204_p9), [#allocation12], 1040   ;;  %p5205_p11 = pmov %p5202_p1 }
  0x93   : > { %v4023_v0 = vld [vmem:[#allocation5 + $0xe4] ss:$16 sps:$4 sm:$0xff]   ;;  %v4027_v2 = vld [vmem:[#allocation5 + $0xe0] ss:$16 sps:$4 sm:$0xff]   ;;  %vm4838_vm0 = vmmov 0   ;;  %s3451_s8 = sshll.u32 %s5046_s29, 4 }
  0x94   : > { %4803 = vsyncadd (%p5205_p11), [#allocation12], 4294966256  ;;  %v4025_v1 = vld [vmem:[#allocation5 + $0x2e4] ss:$16 sps:$4 sm:$0xff]   ;;  %2384 = vmatprep.subr.bf16.mxu0 %v4023_v0  ;;  %v4028_v3 = vld [vmem:[#allocation5 + $0x2e0] ss:$16 sps:$4 sm:$0xff]  }
  0x95   : > { %2427 = vmatprep.subr.bf16.mxu1 %v4025_v1  ;;  %v4029_v4 = vld [vmem:[#allocation5 + $0xc4] ss:$16 sps:$4 sm:$0xff]   ;;  %2385 = vmatpush1.bf16.msra.mxu0 %v4027_v2  ;;  %v4033_v6 = vld [vmem:[#allocation5 + $0xc0] ss:$16 sps:$4 sm:$0xff]   ;;  %s378_s19 = scalar_lea.vmem [#allocation14], %s3451_s8  ;;  %s3829_s12 = sshll.u32 %s4903_s30, 8 }
  0x96   : > { %2428 = vmatpush1.bf16.msra.mxu1 %v4028_v3  ;;  %v4031_v5 = vld [vmem:[#allocation5 + $0x2c4] ss:$16 sps:$4 sm:$0xff]   ;;  %2386 = vmatprep.subr.bf16.mxu0 %v4029_v4  ;;  %v4034_v7 = vld [vmem:[#allocation5 + $0x2c0] ss:$16 sps:$4 sm:$0xff]   ;;  %s3302_s28 = sshll.u32 %s378_s19, 4  ;;  %s5134_s22 = scalar_lea.hbm %s5183_s7, %s3829_s12  ;;  %s5129_s28 = int_to_ptr.vmem [resolvable:$true] %s3302_s28 }
  0x97   : > { %2429 = vmatprep.subr.bf16.mxu1 %v4031_v5  ;;  %v4035_v8 = vld [vmem:[#allocation5 + $0xa4] ss:$16 sps:$4 sm:$0xff]   ;;  %v4039_v10 = vld [vmem:[#allocation5 + $0xa0] ss:$16 sps:$4 sm:$0xff]   ;;  %s3289_s15 = scalar_lea.sflag [#allocation4], %s5046_s29  ;;  %s4746_s17 = scalar_lea.vmem %s5129_s28, 256 }
  0x98   : > { %v4037_v9 = vld [vmem:[#allocation5 + $0x2a4] ss:$16 sps:$4 sm:$0xff]   ;;  %v4040_v11 = vld [vmem:[#allocation5 + $0x2a0] ss:$16 sps:$4 sm:$0xff]   ;;  %p4747_p10 = scmp.ne.s32.totalorder %s5129_s28, %s4746_s17  ;;  %p5206_p5 = scmp.ne.s32.totalorder %s5195_s13, 0 }
  0x99   : > { %2387 = vmatpush1.bf16.msra.mxu0 %v4033_v6  ;;  %v4041_v12 = vld [vmem:[#allocation5 + $0x84] ss:$16 sps:$4 sm:$0xff]   ;;  %v4045_v14 = vld [vmem:[#allocation5 + $0x80] ss:$16 sps:$4 sm:$0xff]   ;;  %s4839_s30 = smov [#allocation14]  }
  0x9a   : > { %2430 = vmatpush1.bf16.msra.mxu1 %v4034_v7  ;;  %2388 = vmatprep.subr.bf16.mxu0 %v4035_v8  ;;  %v4043_v13 = vld [vmem:[#allocation5 + $0x284] ss:$16 sps:$4 sm:$0xff]   ;;  %v4046_v15 = vld [vmem:[#allocation5 + $0x280] ss:$16 sps:$4 sm:$0xff]   ;;  %p4748_p13 = pnand %p4747_p10, %p5206_p5  ;;  %s4750_s1 = sshll.u32 %s4839_s30, 4  ;;  %s4751_s1 = int_to_ptr.vmem [resolvable:$false] %s4750_s1 }
  0x9b   : > { %2431 = vmatprep.subr.bf16.mxu1 %v4037_v9  ;;  %v4047_v16 = vld [vmem:[#allocation5 + $0x64] ss:$16 sps:$4 sm:$0xff]   ;;  %v4051_v18 = vld [vmem:[#allocation5 + $0x60] ss:$16 sps:$4 sm:$0xff]   ;;  %s4752_s16 = scalar_lea.vmem %s4751_s1, 512  ;;  %p4753_p6 = scmp.lt.s32.totalorder %s5129_s28, %s4751_s1 }
  0x9c   : > { %v4049_v17 = vld [vmem:[#allocation5 + $0x264] ss:$16 sps:$4 sm:$0xff]   ;;  %v4052_v19 = vld [vmem:[#allocation5 + $0x260] ss:$16 sps:$4 sm:$0xff]   ;;  %p4749_p0 = pneg %p4748_p13  ;;  %p4754_p8 = scmp.lt.s32.totalorder %s4752_s16, %s4746_s17 }
  0x9d   : > { %2389 = vmatpush1.bf16.msra.mxu0 %v4039_v10  ;;  %v4053_v20 = vld [vmem:[#allocation5 + $0x44] ss:$16 sps:$4 sm:$0xff]   ;;  %v4057_v22 = vld [vmem:[#allocation5 + $0x40] ss:$16 sps:$4 sm:$0xff]  }
  0x9e   : > { %2432 = vmatpush1.bf16.msra.mxu1 %v4040_v11  ;;  %2390 = vmatprep.subr.bf16.mxu0 %v4041_v12  ;;  %v4055_v21 = vld [vmem:[#allocation5 + $0x244] ss:$16 sps:$4 sm:$0xff]   ;;  %v4058_v23 = vld [vmem:[#allocation5 + $0x240] ss:$16 sps:$4 sm:$0xff]   ;;  %p4755_p7 = por %p4754_p8, %p4753_p6 }
  0x9f   : > { %2433 = vmatprep.subr.bf16.mxu1 %v4043_v13  ;;  %v4059_v24 = vld [vmem:[#allocation5 + $0x24] ss:$16 sps:$4 sm:$0xff]   ;;  %v4063_v26 = vld [vmem:[#allocation5 + $0x20] ss:$16 sps:$4 sm:$0xff]  }
  0xa0   : > { %v4061_v25 = vld [vmem:[#allocation5 + $0x224] ss:$16 sps:$4 sm:$0xff]   ;;  %v4064_v27 = vld [vmem:[#allocation5 + $0x220] ss:$16 sps:$4 sm:$0xff]   ;;  %p4756_p3 = pnand %p4755_p7, %p4749_p0 }
  0xa1   : > { %2391 = vmatpush1.bf16.msra.mxu0 %v4045_v14  ;;  %v4065_v28 = vld [vmem:[#allocation5 + $0x4] ss:$16 sps:$4 sm:$0xff]   ;;  %v4069_v30 = vld [vmem:[#allocation5] ss:$16 sps:$4 sm:$0xff]  }
  0xa2   : > { %2434 = vmatpush1.bf16.msra.mxu1 %v4046_v15  ;;  %2392 = vmatprep.subr.bf16.mxu0 %v4047_v16  ;;  %v4067_v29 = vld [vmem:[#allocation5 + $0x204] ss:$16 sps:$4 sm:$0xff]   ;;  %v4070_v31 = vld [vmem:[#allocation5 + $0x200] ss:$16 sps:$4 sm:$0xff]  }
  0xa3   : > { %2435 = vmatprep.subr.bf16.mxu1 %v4049_v17  ;;  %v4071_v32 = vld [vmem:[#allocation5 + $0x1e4] ss:$16 sps:$4 sm:$0xff]   ;;  %v4075_v34 = vld [vmem:[#allocation5 + $0x1e0] ss:$16 sps:$4 sm:$0xff]  }
  0xa4   : > { %v4073_v33 = vld [vmem:[#allocation5 + $0x3e4] ss:$16 sps:$4 sm:$0xff]   ;;  %v4076_v35 = vld [vmem:[#allocation5 + $0x3e0] ss:$16 sps:$4 sm:$0xff]  }
  0xa5   : > { %2393 = vmatpush1.bf16.msra.mxu0 %v4051_v18  ;;  %v4077_v36 = vld [vmem:[#allocation5 + $0x1c4] ss:$16 sps:$4 sm:$0xff]   ;;  %v4081_v38 = vld [vmem:[#allocation5 + $0x1c0] ss:$16 sps:$4 sm:$0xff]  }
  0xa6   : > { %2436 = vmatpush1.bf16.msra.mxu1 %v4052_v19  ;;  %2394 = vmatprep.subr.bf16.mxu0 %v4053_v20  ;;  %v4079_v37 = vld [vmem:[#allocation5 + $0x3c4] ss:$16 sps:$4 sm:$0xff]   ;;  %v4082_v39 = vld [vmem:[#allocation5 + $0x3c0] ss:$16 sps:$4 sm:$0xff]  }
  0xa7   : > { %2437 = vmatprep.subr.bf16.mxu1 %v4055_v21  ;;  %v4083_v40 = vld [vmem:[#allocation5 + $0x1a4] ss:$16 sps:$4 sm:$0xff]   ;;  %v4087_v42 = vld [vmem:[#allocation5 + $0x1a0] ss:$16 sps:$4 sm:$0xff]  }
  0xa8   : > { %v4085_v41 = vld [vmem:[#allocation5 + $0x3a4] ss:$16 sps:$4 sm:$0xff]   ;;  %v4088_v43 = vld [vmem:[#allocation5 + $0x3a0] ss:$16 sps:$4 sm:$0xff]  }
  0xa9   : > { %2395 = vmatpush1.bf16.msra.mxu0 %v4057_v22  ;;  %v4089_v44 = vld [vmem:[#allocation5 + $0x184] ss:$16 sps:$4 sm:$0xff]   ;;  %v4093_v46 = vld [vmem:[#allocation5 + $0x180] ss:$16 sps:$4 sm:$0xff]  }
  0xaa   : > { %2438 = vmatpush1.bf16.msra.mxu1 %v4058_v23  ;;  %2396 = vmatprep.subr.bf16.mxu0 %v4059_v24  ;;  %v4091_v45 = vld [vmem:[#allocation5 + $0x384] ss:$16 sps:$4 sm:$0xff]   ;;  %v4094_v47 = vld [vmem:[#allocation5 + $0x380] ss:$16 sps:$4 sm:$0xff]  }
  0xab   : > { %2439 = vmatprep.subr.bf16.mxu1 %v4061_v25  ;;  %v4095_v48 = vld [vmem:[#allocation5 + $0x164] ss:$16 sps:$4 sm:$0xff]   ;;  %v4099_v52 = vld [vmem:[#allocation5 + $0x160] ss:$16 sps:$4 sm:$0xff]  }
  0xac   : > { %v5069_v49 = vld [vmem:[%s5050_s20 + $0x4] ss:$40 sps:$4 sm:$0xff]   ;;  %v4100_v53 = vld [vmem:[#allocation5 + $0x360] ss:$16 sps:$4 sm:$0xff]  }
  0xad   : > { %2397 = vmatpush1.bf16.msra.mxu0 %v4063_v26  ;;  %v4097_v50 = vld [vmem:[#allocation5 + $0x364] ss:$16 sps:$4 sm:$0xff]   ;;  %2416 = vmatprep.mubr.bf16.mxu0 %v5069_v49  ;;  %v4105_v56 = vld [vmem:[#allocation5 + $0x140] ss:$16 sps:$4 sm:$0xff]  }
  0xae   : > { %2440 = vmatpush1.bf16.msra.mxu1 %v4064_v27  ;;  %2398 = vmatprep.subr.bf16.mxu0 %v4065_v28  ;;  %v4124_v51 = vld [vmem:[%s5050_s20 + $0xc] ss:$40 sps:$4 sm:$0xff]   ;;  %v4106_v57 = vld [vmem:[#allocation5 + $0x340] ss:$16 sps:$4 sm:$0xff]  }
  0xaf   : > { %2441 = vmatprep.subr.bf16.mxu1 %v4067_v29  ;;  %2459 = vmatprep.mubr.bf16.mxu1 %v4124_v51  ;;  %v4101_v54 = vld [vmem:[#allocation5 + $0x144] ss:$16 sps:$4 sm:$0xff]   ;;  %v4111_v60 = vld [vmem:[#allocation5 + $0x120] ss:$16 sps:$4 sm:$0xff]  }
  0xb0   : > { %v4103_v55 = vld [vmem:[#allocation5 + $0x344] ss:$16 sps:$4 sm:$0xff]   ;;  %v4112_v61 = vld [vmem:[#allocation5 + $0x320] ss:$16 sps:$4 sm:$0xff]  }
  0xb1   : > { %2399 = vmatpush1.bf16.msra.mxu0 %v4069_v30  ;;  %v4107_v58 = vld [vmem:[#allocation5 + $0x124] ss:$16 sps:$4 sm:$0xff]   ;;  %v4117_v0 = vld [vmem:[#allocation5 + $0x100] ss:$16 sps:$4 sm:$0xff]  }
  0xb2   : > { %2442 = vmatpush1.bf16.msra.mxu1 %v4070_v31  ;;  %2400 = vmatprep.subr.bf16.mxu0 %v4071_v32  ;;  %v4109_v59 = vld [vmem:[#allocation5 + $0x324] ss:$16 sps:$4 sm:$0xff]   ;;  %v4118_v1 = vld [vmem:[#allocation5 + $0x300] ss:$16 sps:$4 sm:$0xff]  }
  0xb3   : > { %2443 = vmatprep.subr.bf16.mxu1 %v4073_v33  ;;  %v4113_v62 = vld [vmem:[#allocation5 + $0x104] ss:$16 sps:$4 sm:$0xff]   ;;  %v5074_v4 = vld [vmem:[%s5050_s20] ss:$40 sps:$4 sm:$0xff]  }
  0xb4   : > { %v4115_v63 = vld [vmem:[#allocation5 + $0x304] ss:$16 sps:$4 sm:$0xff]   ;;  %v4122_v5 = vld [vmem:[%s5050_s20 + $0x8] ss:$40 sps:$4 sm:$0xff]  }
  0xb5   : > { %2401 = vmatpush2.bf16.msra.mxu0 %v4075_v34  ;;  %v4127_v2 = vld [vmem:[#allocation5 + $0x4e4] ss:$16 sps:$4 sm:$0xff]   ;;  %v4125_v6 = vld [vmem:[#allocation5 + $0x4e0] ss:$16 sps:$4 sm:$0xff]  }
  0xb6   : > { %2444 = vmatpush2.bf16.msra.mxu1 %v4076_v35  ;;  %2402 = vmatprep.subr.bf16.mxu0 %v4077_v36  ;;  %v4130_v3 = vld [vmem:[#allocation5 + $0x6e4] ss:$16 sps:$4 sm:$0xff]   ;;  %v4128_v7 = vld [vmem:[#allocation5 + $0x6e0] ss:$16 sps:$4 sm:$0xff]  }
  0xb7   : > { %2445 = vmatprep.subr.bf16.mxu1 %v4079_v37  ;;  %v4133_v8 = vld [vmem:[#allocation5 + $0x4c4] ss:$16 sps:$4 sm:$0xff]   ;;  %v4131_v10 = vld [vmem:[#allocation5 + $0x4c0] ss:$16 sps:$4 sm:$0xff]  }
  0xb8   : > { %v4136_v9 = vld [vmem:[#allocation5 + $0x6c4] ss:$16 sps:$4 sm:$0xff]   ;;  %v4134_v11 = vld [vmem:[#allocation5 + $0x6c0] ss:$16 sps:$4 sm:$0xff]  }
  0xb9   : > { %2403 = vmatpush2.bf16.msra.mxu0 %v4081_v38  ;;  %v4139_v12 = vld [vmem:[#allocation5 + $0x4a4] ss:$16 sps:$4 sm:$0xff]   ;;  %v4137_v14 = vld [vmem:[#allocation5 + $0x4a0] ss:$16 sps:$4 sm:$0xff]  }
  0xba   : > { %2446 = vmatpush2.bf16.msra.mxu1 %v4082_v39  ;;  %2404 = vmatprep.subr.bf16.mxu0 %v4083_v40  ;;  %v4142_v13 = vld [vmem:[#allocation5 + $0x6a4] ss:$16 sps:$4 sm:$0xff]   ;;  %v4140_v15 = vld [vmem:[#allocation5 + $0x6a0] ss:$16 sps:$4 sm:$0xff]  }
  0xbb   : > { %2447 = vmatprep.subr.bf16.mxu1 %v4085_v41  ;;  %v4145_v16 = vld [vmem:[#allocation5 + $0x484] ss:$16 sps:$4 sm:$0xff]   ;;  %v4143_v18 = vld [vmem:[#allocation5 + $0x480] ss:$16 sps:$4 sm:$0xff]  }
  0xbc   : > { %v4148_v17 = vld [vmem:[#allocation5 + $0x684] ss:$16 sps:$4 sm:$0xff]   ;;  %v4146_v19 = vld [vmem:[#allocation5 + $0x680] ss:$16 sps:$4 sm:$0xff]  }
  0xbd   : > { %2405 = vmatpush2.bf16.msra.mxu0 %v4087_v42  ;;  %v4151_v20 = vld [vmem:[#allocation5 + $0x464] ss:$16 sps:$4 sm:$0xff]   ;;  %v4149_v22 = vld [vmem:[#allocation5 + $0x460] ss:$16 sps:$4 sm:$0xff]  }
  0xbe   : > { %2448 = vmatpush2.bf16.msra.mxu1 %v4088_v43  ;;  %2406 = vmatprep.subr.bf16.mxu0 %v4089_v44  ;;  %v4154_v21 = vld [vmem:[#allocation5 + $0x664] ss:$16 sps:$4 sm:$0xff]   ;;  %v4152_v23 = vld [vmem:[#allocation5 + $0x660] ss:$16 sps:$4 sm:$0xff]  }
  0xbf   : > { %2449 = vmatprep.subr.bf16.mxu1 %v4091_v45  ;;  %v4157_v24 = vld [vmem:[#allocation5 + $0x444] ss:$16 sps:$4 sm:$0xff]   ;;  %v4155_v26 = vld [vmem:[#allocation5 + $0x440] ss:$16 sps:$4 sm:$0xff]  }
  0xc0   : > { %v4160_v25 = vld [vmem:[#allocation5 + $0x644] ss:$16 sps:$4 sm:$0xff]   ;;  %v4158_v27 = vld [vmem:[#allocation5 + $0x640] ss:$16 sps:$4 sm:$0xff]  }
  0xc1   : > { %2407 = vmatpush2.bf16.msra.mxu0 %v4093_v46  ;;  %v4163_v28 = vld [vmem:[#allocation5 + $0x424] ss:$16 sps:$4 sm:$0xff]   ;;  %v4161_v30 = vld [vmem:[#allocation5 + $0x420] ss:$16 sps:$4 sm:$0xff]  }
  0xc2   : > { %2450 = vmatpush2.bf16.msra.mxu1 %v4094_v47  ;;  %2408 = vmatprep.subr.bf16.mxu0 %v4095_v48  ;;  %v4166_v29 = vld [vmem:[#allocation5 + $0x624] ss:$16 sps:$4 sm:$0xff]   ;;  %v4164_v31 = vld [vmem:[#allocation5 + $0x620] ss:$16 sps:$4 sm:$0xff]  }
  0xc3   : > { %2451 = vmatprep.subr.bf16.mxu1 %v4097_v50  ;;  %v4169_v32 = vld [vmem:[#allocation5 + $0x404] ss:$16 sps:$4 sm:$0xff]   ;;  %v4167_v36 = vld [vmem:[#allocation5 + $0x400] ss:$16 sps:$4 sm:$0xff]  }
  0xc4   : > { %v4172_v33 = vld [vmem:[#allocation5 + $0x604] ss:$16 sps:$4 sm:$0xff]   ;;  %v4170_v37 = vld [vmem:[#allocation5 + $0x600] ss:$16 sps:$4 sm:$0xff]  }
  0xc5   : > { %2409 = vmatpush2.bf16.msra.mxu0 %v4099_v52  ;;  %v5079_v34 = vld [vmem:[%s5050_s20 + $0x14] ss:$40 sps:$4 sm:$0xff]   ;;  %v4173_v40 = vld [vmem:[#allocation5 + $0x5e0] ss:$16 sps:$4 sm:$0xff]  }
  0xc6   : > { %2452 = vmatpush2.bf16.msra.mxu1 %v4100_v53  ;;  %2410 = vmatprep.subr.bf16.mxu0 %v4101_v54  ;;  %v4226_v35 = vld [vmem:[%s5050_s20 + $0x1c] ss:$40 sps:$4 sm:$0xff]   ;;  %v4176_v41 = vld [vmem:[#allocation5 + $0x7e0] ss:$16 sps:$4 sm:$0xff]  }
  0xc7   : > { %2453 = vmatprep.subr.bf16.mxu1 %v4103_v55  ;;  %v4175_v38 = vld [vmem:[#allocation5 + $0x5e4] ss:$16 sps:$4 sm:$0xff]   ;;  %v4179_v44 = vld [vmem:[#allocation5 + $0x5c0] ss:$16 sps:$4 sm:$0xff]  }
  0xc8   : > { %v4178_v39 = vld [vmem:[#allocation5 + $0x7e4] ss:$16 sps:$4 sm:$0xff]   ;;  %v4182_v45 = vld [vmem:[#allocation5 + $0x7c0] ss:$16 sps:$4 sm:$0xff]  }
  0xc9   : > { %2411 = vmatpush2.bf16.msra.mxu0 %v4105_v56  ;;  %v4181_v42 = vld [vmem:[#allocation5 + $0x5c4] ss:$16 sps:$4 sm:$0xff]   ;;  %v4185_v48 = vld [vmem:[#allocation5 + $0x5a0] ss:$16 sps:$4 sm:$0xff]  }
  0xca   : > { %2454 = vmatpush2.bf16.msra.mxu1 %v4106_v57  ;;  %2412 = vmatprep.subr.bf16.mxu0 %v4107_v58  ;;  %v4184_v43 = vld [vmem:[#allocation5 + $0x7c4] ss:$16 sps:$4 sm:$0xff]   ;;  %v4188_v50 = vld [vmem:[#allocation5 + $0x7a0] ss:$16 sps:$4 sm:$0xff]  }
  0xcb   : > { %2455 = vmatprep.subr.bf16.mxu1 %v4109_v59  ;;  %v4187_v46 = vld [vmem:[#allocation5 + $0x5a4] ss:$16 sps:$4 sm:$0xff]   ;;  %v4191_v53 = vld [vmem:[#allocation5 + $0x580] ss:$16 sps:$4 sm:$0xff]  }
  0xcc   : > { %v4190_v47 = vld [vmem:[#allocation5 + $0x7a4] ss:$16 sps:$4 sm:$0xff]   ;;  %v4194_v54 = vld [vmem:[#allocation5 + $0x780] ss:$16 sps:$4 sm:$0xff]  }
  0xcd   : > { %2413 = vmatpush2.bf16.msra.mxu0 %v4111_v60  ;;  %v4193_v51 = vld [vmem:[#allocation5 + $0x584] ss:$16 sps:$4 sm:$0xff]   ;;  %v4197_v57 = vld [vmem:[#allocation5 + $0x560] ss:$16 sps:$4 sm:$0xff]  }
  0xce   : > { %2456 = vmatpush2.bf16.msra.mxu1 %v4112_v61  ;;  %2414 = vmatprep.subr.bf16.mxu0 %v4113_v62  ;;  %v4196_v52 = vld [vmem:[#allocation5 + $0x784] ss:$16 sps:$4 sm:$0xff]   ;;  %v4200_v58 = vld [vmem:[#allocation5 + $0x760] ss:$16 sps:$4 sm:$0xff]  }
  0xcf   : > { %2457 = vmatprep.subr.bf16.mxu1 %v4115_v63  ;;  %v4199_v55 = vld [vmem:[#allocation5 + $0x564] ss:$16 sps:$4 sm:$0xff]   ;;  %v4203_v61 = vld [vmem:[#allocation5 + $0x540] ss:$16 sps:$4 sm:$0xff]  }
  0xd0   : > { %v4202_v56 = vld [vmem:[#allocation5 + $0x764] ss:$16 sps:$4 sm:$0xff]   ;;  %v4206_v62 = vld [vmem:[#allocation5 + $0x740] ss:$16 sps:$4 sm:$0xff]  }
  0xd1   : > { %2415 = vmatpush2.bf16.msra.mxu0 %v4117_v0  ;;  %v4205_v59 = vld [vmem:[#allocation5 + $0x544] ss:$16 sps:$4 sm:$0xff]  }
  0xd2   : > { %2458 = vmatpush2.bf16.msra.mxu1 %v4118_v1  ;;  %2470 = vmatprep.subr.bf16.mxu0 %v4127_v2  ;;  %v4208_v60 = vld [vmem:[#allocation5 + $0x744] ss:$16 sps:$4 sm:$0xff]   ;;  %v4209_v1 = vld [vmem:[#allocation5 + $0x520] ss:$16 sps:$4 sm:$0xff]  }
  0xd3   : > { %2513 = vmatprep.subr.bf16.mxu1 %v4130_v3  ;;  %v4211_v63 = vld [vmem:[#allocation5 + $0x524] ss:$16 sps:$4 sm:$0xff]   ;;  %v4212_v2 = vld [vmem:[#allocation5 + $0x720] ss:$16 sps:$4 sm:$0xff]  }
  0xd4   : > { %2417 = vmatmul.mubr.bf16.vlgmr.msra.gmra.mxu0 %v5074_v4  ;;  %v4214_v0 = vld [vmem:[#allocation5 + $0x724] ss:$16 sps:$4 sm:$0xff]  }
  0xd5   : > { %2460 = vmatmul.mubr.bf16.vlgmr.msra.gmra.mxu1 %v4122_v5  ;;  %2471 = vmatpush1.bf16.msra.mxu0 %v4125_v6  ;;  %v4217_v3 = vld [vmem:[#allocation5 + $0x504] ss:$16 sps:$4 sm:$0xff]   ;;  %v4215_v6 = vld [vmem:[#allocation5 + $0x500] ss:$16 sps:$4 sm:$0xff]  }
  0xd6   : > { %2514 = vmatpush1.bf16.msra.mxu1 %v4128_v7  ;;  %2472 = vmatprep.subr.bf16.mxu0 %v4133_v8  ;;  %v4220_v5 = vld [vmem:[#allocation5 + $0x704] ss:$16 sps:$4 sm:$0xff]   ;;  %v4218_v7 = vld [vmem:[#allocation5 + $0x700] ss:$16 sps:$4 sm:$0xff]  }
  0xd7   : > { %2515 = vmatprep.subr.bf16.mxu1 %v4136_v9  ;;  %2502 = vmatprep.mubr.bf16.mxu0 %v5079_v34  ;;  %v4229_v8 = vld [vmem:[#allocation5 + $0x8e4] ss:$16 sps:$4 sm:$0xff]   ;;  %v4232_v9 = vld [vmem:[#allocation5 + $0xec] ss:$16 sps:$4 sm:$0xff]  }
  0xd8   : > { %2545 = vmatprep.mubr.bf16.mxu1 %v4226_v35  ;;  %v4265_v35 = vld [vmem:[#allocation5 + $0x824] ss:$16 sps:$4 sm:$0xff]  }
  0xd9   : > { %2473 = vmatpush1.bf16.msra.mxu0 %v4131_v10  ;;  %v5084_v10 = vld [vmem:[%s5050_s20 + $0x10] ss:$40 sps:$4 sm:$0xff]  }
  0xda   : > { %2516 = vmatpush1.bf16.msra.mxu1 %v4134_v11  ;;  %2474 = vmatprep.subr.bf16.mxu0 %v4139_v12  ;;  %v4224_v11 = vld [vmem:[%s5050_s20 + $0x18] ss:$40 sps:$4 sm:$0xff]  }
  0xdb   : > { %2517 = vmatprep.subr.bf16.mxu1 %v4142_v13  ;;  %v4227_v12 = vld [vmem:[#allocation5 + $0x8e0] ss:$16 sps:$4 sm:$0xff]   ;;  %v4230_v13 = vld [vmem:[#allocation5 + $0xe8] ss:$16 sps:$4 sm:$0xff]  }
  0xdd   : > { %2475 = vmatpush1.bf16.msra.mxu0 %v4137_v14  ;;  %v4235_v14 = vld [vmem:[#allocation5 + $0x8c4] ss:$16 sps:$4 sm:$0xff]  }
  0xde   : > { %2518 = vmatpush1.bf16.msra.mxu1 %v4140_v15  ;;  %2476 = vmatprep.subr.bf16.mxu0 %v4145_v16  ;;  %v4238_v15 = vld [vmem:[#allocation5 + $0xcc] ss:$16 sps:$4 sm:$0xff]   ;;  %v4233_v16 = vld [vmem:[#allocation5 + $0x8c0] ss:$16 sps:$4 sm:$0xff]  }
  0xdf   : > { %2519 = vmatprep.subr.bf16.mxu1 %v4148_v17  ;;  %v4236_v17 = vld [vmem:[#allocation5 + $0xc8] ss:$16 sps:$4 sm:$0xff]  }
  0xe1   : > { %2477 = vmatpush1.bf16.msra.mxu0 %v4143_v18  ;;  %v4241_v18 = vld [vmem:[#allocation5 + $0x8a4] ss:$16 sps:$4 sm:$0xff]  }
  0xe2   : > { %2520 = vmatpush1.bf16.msra.mxu1 %v4146_v19  ;;  %2478 = vmatprep.subr.bf16.mxu0 %v4151_v20  ;;  %v4244_v19 = vld [vmem:[#allocation5 + $0xac] ss:$16 sps:$4 sm:$0xff]  }
  0xe3   : > { %2521 = vmatprep.subr.bf16.mxu1 %v4154_v21  ;;  %v5089_v20 = vld [vmem:[%s5050_s20 + $0x24] ss:$40 sps:$4 sm:$0xff]   ;;  %v4239_v21 = vld [vmem:[#allocation5 + $0x8a0] ss:$16 sps:$4 sm:$0xff]  }
  0xe5   : > { %2479 = vmatpush1.bf16.msra.mxu0 %v4149_v22  ;;  %v4242_v22 = vld [vmem:[#allocation5 + $0xa8] ss:$16 sps:$4 sm:$0xff]  }
  0xe6   : > { %2522 = vmatpush1.bf16.msra.mxu1 %v4152_v23  ;;  %2480 = vmatprep.subr.bf16.mxu0 %v4157_v24  ;;  %v4247_v23 = vld [vmem:[#allocation5 + $0x884] ss:$16 sps:$4 sm:$0xff]   ;;  %v4250_v24 = vld [vmem:[#allocation5 + $0x8c] ss:$16 sps:$4 sm:$0xff]  }
  0xe7   : > { %2523 = vmatprep.subr.bf16.mxu1 %v4160_v25  ;;  %v4245_v25 = vld [vmem:[#allocation5 + $0x880] ss:$16 sps:$4 sm:$0xff]  }
  0xe9   : > { %2481 = vmatpush1.bf16.msra.mxu0 %v4155_v26  ;;  %v4248_v26 = vld [vmem:[#allocation5 + $0x88] ss:$16 sps:$4 sm:$0xff]  }
  0xea   : > { %2524 = vmatpush1.bf16.msra.mxu1 %v4158_v27  ;;  %2482 = vmatprep.subr.bf16.mxu0 %v4163_v28  ;;  %v4253_v27 = vld [vmem:[#allocation5 + $0x864] ss:$16 sps:$4 sm:$0xff]   ;;  %v4256_v28 = vld [vmem:[#allocation5 + $0x6c] ss:$16 sps:$4 sm:$0xff]  }
  0xeb   : > { %2525 = vmatprep.subr.bf16.mxu1 %v4166_v29  ;;  %v4251_v29 = vld [vmem:[#allocation5 + $0x860] ss:$16 sps:$4 sm:$0xff]  }
  0xed   : > { %2483 = vmatpush1.bf16.msra.mxu0 %v4161_v30  ;;  %v4259_v30 = vld [vmem:[#allocation5 + $0x844] ss:$16 sps:$4 sm:$0xff]  }
  0xee   : > { %2526 = vmatpush1.bf16.msra.mxu1 %v4164_v31  ;;  %2484 = vmatprep.subr.bf16.mxu0 %v4169_v32  ;;  %v4262_v31 = vld [vmem:[#allocation5 + $0x4c] ss:$16 sps:$4 sm:$0xff]   ;;  %v4257_v32 = vld [vmem:[#allocation5 + $0x840] ss:$16 sps:$4 sm:$0xff]  }
  0xef   : > { %2527 = vmatprep.subr.bf16.mxu1 %v4172_v33  ;;  %v4260_v33 = vld [vmem:[#allocation5 + $0x48] ss:$16 sps:$4 sm:$0xff]  }
  0xf1   : > { %2485 = vmatpush1.bf16.msra.mxu0 %v4167_v36  ;;  %v4268_v36 = vld [vmem:[#allocation5 + $0x2c] ss:$16 sps:$4 sm:$0xff]  }
  0xf2   : > { %2528 = vmatpush1.bf16.msra.mxu1 %v4170_v37  ;;  %2486 = vmatprep.subr.bf16.mxu0 %v4175_v38  ;;  %v4263_v37 = vld [vmem:[#allocation5 + $0x820] ss:$16 sps:$4 sm:$0xff]   ;;  %v4266_v38 = vld [vmem:[#allocation5 + $0x28] ss:$16 sps:$4 sm:$0xff]  }
  0xf3   : > { %2529 = vmatprep.subr.bf16.mxu1 %v4178_v39  ;;  %v4271_v39 = vld [vmem:[#allocation5 + $0x804] ss:$16 sps:$4 sm:$0xff]  }
  0xf5   : > { %2487 = vmatpush2.bf16.msra.mxu0 %v4173_v40  ;;  %v4274_v40 = vld [vmem:[#allocation5 + $0xc] ss:$16 sps:$4 sm:$0xff]  }
  0xf6   : > { %2530 = vmatpush2.bf16.msra.mxu1 %v4176_v41  ;;  %2488 = vmatprep.subr.bf16.mxu0 %v4181_v42  ;;  %v4269_v41 = vld [vmem:[#allocation5 + $0x800] ss:$16 sps:$4 sm:$0xff]   ;;  %v4272_v42 = vld [vmem:[#allocation5 + $0x8] ss:$16 sps:$4 sm:$0xff]  }
  0xf7   : > { %2531 = vmatprep.subr.bf16.mxu1 %v4184_v43  ;;  %v4277_v43 = vld [vmem:[#allocation5 + $0x9e4] ss:$16 sps:$4 sm:$0xff]  }
  0xf9   : > { %2489 = vmatpush2.bf16.msra.mxu0 %v4179_v44  ;;  %v4280_v44 = vld [vmem:[#allocation5 + $0x1ec] ss:$16 sps:$4 sm:$0xff]  }
  0xfa   : > { %2532 = vmatpush2.bf16.msra.mxu1 %v4182_v45  ;;  %2490 = vmatprep.subr.bf16.mxu0 %v4187_v46  ;;  %v4275_v45 = vld [vmem:[#allocation5 + $0x9e0] ss:$16 sps:$4 sm:$0xff]   ;;  %v4278_v46 = vld [vmem:[#allocation5 + $0x1e8] ss:$16 sps:$4 sm:$0xff]  }
  0xfb   : > { %2533 = vmatprep.subr.bf16.mxu1 %v4190_v47  ;;  %v4283_v47 = vld [vmem:[#allocation5 + $0x9c4] ss:$16 sps:$4 sm:$0xff]  }
  0xfd   : > { %2491 = vmatpush2.bf16.msra.mxu0 %v4185_v48  ;;  %v4286_v48 = vld [vmem:[#allocation5 + $0x1cc] ss:$16 sps:$4 sm:$0xff]  }
  0xfe   : > { %2534 = vmatpush2.bf16.msra.mxu1 %v4188_v50  ;;  %2492 = vmatprep.subr.bf16.mxu0 %v4193_v51  ;;  %v4281_v50 = vld [vmem:[#allocation5 + $0x9c0] ss:$16 sps:$4 sm:$0xff]   ;;  %v4284_v51 = vld [vmem:[#allocation5 + $0x1c8] ss:$16 sps:$4 sm:$0xff]  }
  0xff   : > { %2535 = vmatprep.subr.bf16.mxu1 %v4196_v52  ;;  %v4289_v52 = vld [vmem:[#allocation5 + $0x9a4] ss:$16 sps:$4 sm:$0xff]  }
 0x101   : > { %2493 = vmatpush2.bf16.msra.mxu0 %v4191_v53  ;;  %v4292_v53 = vld [vmem:[#allocation5 + $0x1ac] ss:$16 sps:$4 sm:$0xff]  }
 0x102   : > { %2536 = vmatpush2.bf16.msra.mxu1 %v4194_v54  ;;  %2494 = vmatprep.subr.bf16.mxu0 %v4199_v55  ;;  %v4287_v54 = vld [vmem:[#allocation5 + $0x9a0] ss:$16 sps:$4 sm:$0xff]   ;;  %v4290_v55 = vld [vmem:[#allocation5 + $0x1a8] ss:$16 sps:$4 sm:$0xff]  }
 0x103   : > { %2537 = vmatprep.subr.bf16.mxu1 %v4202_v56  ;;  %v4295_v56 = vld [vmem:[#allocation5 + $0x984] ss:$16 sps:$4 sm:$0xff]  }
 0x105   : > { %2495 = vmatpush2.bf16.msra.mxu0 %v4197_v57  ;;  %v4298_v57 = vld [vmem:[#allocation5 + $0x18c] ss:$16 sps:$4 sm:$0xff]  }
 0x106   : > { %2538 = vmatpush2.bf16.msra.mxu1 %v4200_v58  ;;  %2496 = vmatprep.subr.bf16.mxu0 %v4205_v59  ;;  %v4293_v58 = vld [vmem:[#allocation5 + $0x980] ss:$16 sps:$4 sm:$0xff]   ;;  %v4296_v59 = vld [vmem:[#allocation5 + $0x188] ss:$16 sps:$4 sm:$0xff]  }
 0x107   : > { %2539 = vmatprep.subr.bf16.mxu1 %v4208_v60  ;;  %v4301_v60 = vld [vmem:[#allocation5 + $0x964] ss:$16 sps:$4 sm:$0xff]  }
 0x109   : > { %2497 = vmatpush2.bf16.msra.mxu0 %v4203_v61  ;;  %v4304_v61 = vld [vmem:[#allocation5 + $0x16c] ss:$16 sps:$4 sm:$0xff]  }
 0x10a   : > { %2540 = vmatpush2.bf16.msra.mxu1 %v4206_v62  ;;  %2498 = vmatprep.subr.bf16.mxu0 %v4211_v63  ;;  %v4299_v62 = vld [vmem:[#allocation5 + $0x960] ss:$16 sps:$4 sm:$0xff]   ;;  %v4302_v63 = vld [vmem:[#allocation5 + $0x168] ss:$16 sps:$4 sm:$0xff]  }
 0x10b   : > { %2541 = vmatprep.subr.bf16.mxu1 %v4214_v0  ;;  %v4307_v0 = vld [vmem:[#allocation5 + $0x944] ss:$16 sps:$4 sm:$0xff]  }
 0x10d   : > { %2499 = vmatpush2.bf16.msra.mxu0 %v4209_v1  ;;  %v4310_v1 = vld [vmem:[#allocation5 + $0x14c] ss:$16 sps:$4 sm:$0xff]  }
 0x10e   : > { %2542 = vmatpush2.bf16.msra.mxu1 %v4212_v2  ;;  %2500 = vmatprep.subr.bf16.mxu0 %v4217_v3  ;;  %v4305_v2 = vld [vmem:[#allocation5 + $0x940] ss:$16 sps:$4 sm:$0xff]   ;;  %v4308_v3 = vld [vmem:[#allocation5 + $0x148] ss:$16 sps:$4 sm:$0xff]  }
 0x10f   : > { %2543 = vmatprep.subr.bf16.mxu1 %v4220_v5  ;;  %v4313_v5 = vld [vmem:[#allocation5 + $0x924] ss:$16 sps:$4 sm:$0xff]  }
 0x111   : > { %2501 = vmatpush2.bf16.msra.mxu0 %v4215_v6  ;;  %v4316_v6 = vld [vmem:[#allocation5 + $0x12c] ss:$16 sps:$4 sm:$0xff]  }
 0x112   : > { %2544 = vmatpush2.bf16.msra.mxu1 %v4218_v7  ;;  %2556 = vmatprep.subr.bf16.mxu0 %v4229_v8  ;;  %v4311_v7 = vld [vmem:[#allocation5 + $0x920] ss:$16 sps:$4 sm:$0xff]   ;;  %v4314_v8 = vld [vmem:[#allocation5 + $0x128] ss:$16 sps:$4 sm:$0xff]  }
 0x113   : > { %2599 = vmatprep.subr.bf16.mxu1 %v4232_v9  ;;  %v4319_v9 = vld [vmem:[#allocation5 + $0x904] ss:$16 sps:$4 sm:$0xff]  }
 0x114   : > { %2503 = vmatmul.mubr.bf16.vlgmr.msra.gmra.mxu0 %v5084_v10 }
 0x115   : > { %2546 = vmatmul.mubr.bf16.vlgmr.msra.gmra.mxu1 %v4224_v11  ;;  %2557 = vmatpush1.bf16.msra.mxu0 %v4227_v12  ;;  %v4322_v11 = vld [vmem:[#allocation5 + $0x10c] ss:$16 sps:$4 sm:$0xff]   ;;  %v4317_v12 = vld [vmem:[#allocation5 + $0x900] ss:$16 sps:$4 sm:$0xff]  }
 0x116   : > { %2600 = vmatpush1.bf16.msra.mxu1 %v4230_v13  ;;  %2558 = vmatprep.subr.bf16.mxu0 %v4235_v14  ;;  %v4320_v13 = vld [vmem:[#allocation5 + $0x108] ss:$16 sps:$4 sm:$0xff]   ;;  %v4328_v14 = vld [vmem:[#allocation5 + $0x2ec] ss:$16 sps:$4 sm:$0xff]  }
 0x117   : > { %2601 = vmatprep.subr.bf16.mxu1 %v4238_v15  ;;  %2631 = vmatprep.mubr.bf16.mxu1 %v5069_v49  ;;  %v4254_v49 = vld [vmem:[#allocation5 + $0x68] ss:$16 sps:$4 sm:$0xff]   ;;  %v4331_v15 = vld [vmem:[#allocation5 + $0x4ec] ss:$16 sps:$4 sm:$0xff]  }
 0x118   : > { %2588 = vmatprep.mubr.bf16.mxu0 %v5089_v20 }
 0x119   : > { %2559 = vmatpush1.bf16.msra.mxu0 %v4233_v16  ;;  %v5094_v16 = vld [vmem:[%s5050_s20 + $0x20] ss:$40 sps:$4 sm:$0xff]  }
 0x11a   : > { %2602 = vmatpush1.bf16.msra.mxu1 %v4236_v17  ;;  %2560 = vmatprep.subr.bf16.mxu0 %v4241_v18  ;;  %v4326_v17 = vld [vmem:[#allocation5 + $0x2e8] ss:$16 sps:$4 sm:$0xff]  }
 0x11b   : > { %2603 = vmatprep.subr.bf16.mxu1 %v4244_v19  ;;  %v4329_v18 = vld [vmem:[#allocation5 + $0x4e8] ss:$16 sps:$4 sm:$0xff]   ;;  %v4334_v19 = vld [vmem:[#allocation5 + $0x2cc] ss:$16 sps:$4 sm:$0xff]  }
 0x11d   : > { %2561 = vmatpush1.bf16.msra.mxu0 %v4239_v21  ;;  %v4337_v21 = vld [vmem:[#allocation5 + $0x4cc] ss:$16 sps:$4 sm:$0xff]  }
 0x11e   : > { %2604 = vmatpush1.bf16.msra.mxu1 %v4242_v22  ;;  %2562 = vmatprep.subr.bf16.mxu0 %v4247_v23  ;;  %v4332_v22 = vld [vmem:[#allocation5 + $0x2c8] ss:$16 sps:$4 sm:$0xff]  }
 0x11f   : > { %2605 = vmatprep.subr.bf16.mxu1 %v4250_v24  ;;  %v4335_v23 = vld [vmem:[#allocation5 + $0x4c8] ss:$16 sps:$4 sm:$0xff]   ;;  %v4340_v24 = vld [vmem:[#allocation5 + $0x2ac] ss:$16 sps:$4 sm:$0xff]  }
 0x121   : > { %2563 = vmatpush1.bf16.msra.mxu0 %v4245_v25  ;;  %v4343_v25 = vld [vmem:[#allocation5 + $0x4ac] ss:$16 sps:$4 sm:$0xff]  }
 0x122   : > { %2606 = vmatpush1.bf16.msra.mxu1 %v4248_v26  ;;  %2564 = vmatprep.subr.bf16.mxu0 %v4253_v27  ;;  %v4558_v26 = vld [vmem:[%s5050_s20 + $0xc] ss:$40 sps:$4 sm:$0xff]   ;;  %v4338_v27 = vld [vmem:[#allocation5 + $0x2a8] ss:$16 sps:$4 sm:$0xff]  }
 0x123   : > { %2607 = vmatprep.subr.bf16.mxu1 %v4256_v28  ;;  %v4341_v28 = vld [vmem:[#allocation5 + $0x4a8] ss:$16 sps:$4 sm:$0xff]  }
 0x125   : > { %2565 = vmatpush1.bf16.msra.mxu0 %v4251_v29  ;;  %v4346_v29 = vld [vmem:[#allocation5 + $0x28c] ss:$16 sps:$4 sm:$0xff]  }
 0x126   : > { %2608 = vmatpush1.bf16.msra.mxu1 %v4254_v49  ;;  %2566 = vmatprep.subr.bf16.mxu0 %v4259_v30  ;;  %v4344_v49 = vld [vmem:[#allocation5 + $0x288] ss:$16 sps:$4 sm:$0xff]  }
 0x127   : > { %2609 = vmatprep.subr.bf16.mxu1 %v4262_v31  ;;  %v4347_v30 = vld [vmem:[#allocation5 + $0x488] ss:$16 sps:$4 sm:$0xff]   ;;  %v4352_v31 = vld [vmem:[#allocation5 + $0x26c] ss:$16 sps:$4 sm:$0xff]  }
 0x129   : > { %2567 = vmatpush1.bf16.msra.mxu0 %v4257_v32  ;;  %v4355_v32 = vld [vmem:[#allocation5 + $0x46c] ss:$16 sps:$4 sm:$0xff]  }
 0x12a   : > { %2610 = vmatpush1.bf16.msra.mxu1 %v4260_v33  ;;  %2568 = vmatprep.subr.bf16.mxu0 %v4265_v35  ;;  %v4350_v33 = vld [vmem:[#allocation5 + $0x268] ss:$16 sps:$4 sm:$0xff]   ;;  %v4358_v35 = vld [vmem:[#allocation5 + $0x24c] ss:$16 sps:$4 sm:$0xff]  }
 0x12b   : > { %2611 = vmatprep.subr.bf16.mxu1 %v4268_v36  ;;  %v4361_v36 = vld [vmem:[#allocation5 + $0x44c] ss:$16 sps:$4 sm:$0xff]  }
 0x12d   : > { %2569 = vmatpush1.bf16.msra.mxu0 %v4263_v37  ;;  %v4356_v37 = vld [vmem:[#allocation5 + $0x248] ss:$16 sps:$4 sm:$0xff]  }
 0x12e   : > { %2612 = vmatpush1.bf16.msra.mxu1 %v4266_v38  ;;  %2570 = vmatprep.subr.bf16.mxu0 %v4271_v39  ;;  %v4359_v38 = vld [vmem:[#allocation5 + $0x448] ss:$16 sps:$4 sm:$0xff]   ;;  %v4364_v39 = vld [vmem:[#allocation5 + $0x22c] ss:$16 sps:$4 sm:$0xff]  }
 0x12f   : > { %2613 = vmatprep.subr.bf16.mxu1 %v4274_v40  ;;  %v4367_v40 = vld [vmem:[#allocation5 + $0x42c] ss:$16 sps:$4 sm:$0xff]  }
 0x131   : > { %2571 = vmatpush1.bf16.msra.mxu0 %v4269_v41  ;;  %v4362_v41 = vld [vmem:[#allocation5 + $0x228] ss:$16 sps:$4 sm:$0xff]  }
 0x132   : > { %2614 = vmatpush1.bf16.msra.mxu1 %v4272_v42  ;;  %2572 = vmatprep.subr.bf16.mxu0 %v4277_v43  ;;  %v4365_v42 = vld [vmem:[#allocation5 + $0x428] ss:$16 sps:$4 sm:$0xff]   ;;  %v4370_v43 = vld [vmem:[#allocation5 + $0x20c] ss:$16 sps:$4 sm:$0xff]  }
 0x133   : > { %2615 = vmatprep.subr.bf16.mxu1 %v4280_v44  ;;  %v4373_v44 = vld [vmem:[#allocation5 + $0x40c] ss:$16 sps:$4 sm:$0xff]  }
 0x135   : > { %2573 = vmatpush2.bf16.msra.mxu0 %v4275_v45  ;;  %v4368_v45 = vld [vmem:[#allocation5 + $0x208] ss:$16 sps:$4 sm:$0xff]  }
 0x136   : > { %2616 = vmatpush2.bf16.msra.mxu1 %v4278_v46  ;;  %2574 = vmatprep.subr.bf16.mxu0 %v4283_v47  ;;  %v4371_v46 = vld [vmem:[#allocation5 + $0x408] ss:$16 sps:$4 sm:$0xff]   ;;  %v4376_v47 = vld [vmem:[#allocation5 + $0x3ec] ss:$16 sps:$4 sm:$0xff]  }
 0x137   : > { %2617 = vmatprep.subr.bf16.mxu1 %v4286_v48  ;;  %v4379_v48 = vld [vmem:[#allocation5 + $0x5ec] ss:$16 sps:$4 sm:$0xff]  }
 0x139   : > { %2575 = vmatpush2.bf16.msra.mxu0 %v4281_v50  ;;  %v4374_v50 = vld [vmem:[#allocation5 + $0x3e8] ss:$16 sps:$4 sm:$0xff]  }
 0x13a   : > { %2618 = vmatpush2.bf16.msra.mxu1 %v4284_v51  ;;  %2576 = vmatprep.subr.bf16.mxu0 %v4289_v52  ;;  %v4377_v51 = vld [vmem:[#allocation5 + $0x5e8] ss:$16 sps:$4 sm:$0xff]   ;;  %v4382_v52 = vld [vmem:[#allocation5 + $0x3cc] ss:$16 sps:$4 sm:$0xff]  }
 0x13b   : > { %2619 = vmatprep.subr.bf16.mxu1 %v4292_v53  ;;  %v4385_v53 = vld [vmem:[#allocation5 + $0x5cc] ss:$16 sps:$4 sm:$0xff]  }
 0x13d   : > { %2577 = vmatpush2.bf16.msra.mxu0 %v4287_v54  ;;  %v4380_v54 = vld [vmem:[#allocation5 + $0x3c8] ss:$16 sps:$4 sm:$0xff]  }
 0x13e   : > { %2620 = vmatpush2.bf16.msra.mxu1 %v4290_v55  ;;  %2578 = vmatprep.subr.bf16.mxu0 %v4295_v56  ;;  %v4383_v55 = vld [vmem:[#allocation5 + $0x5c8] ss:$16 sps:$4 sm:$0xff]   ;;  %v4388_v56 = vld [vmem:[#allocation5 + $0x3ac] ss:$16 sps:$4 sm:$0xff]  }
 0x13f   : > { %2621 = vmatprep.subr.bf16.mxu1 %v4298_v57  ;;  %v4391_v57 = vld [vmem:[#allocation5 + $0x5ac] ss:$16 sps:$4 sm:$0xff]  }
 0x141   : > { %2579 = vmatpush2.bf16.msra.mxu0 %v4293_v58  ;;  %v4386_v58 = vld [vmem:[#allocation5 + $0x3a8] ss:$16 sps:$4 sm:$0xff]  }
 0x142   : > { %2622 = vmatpush2.bf16.msra.mxu1 %v4296_v59  ;;  %2580 = vmatprep.subr.bf16.mxu0 %v4301_v60  ;;  %v4389_v59 = vld [vmem:[#allocation5 + $0x5a8] ss:$16 sps:$4 sm:$0xff]   ;;  %v4394_v60 = vld [vmem:[#allocation5 + $0x38c] ss:$16 sps:$4 sm:$0xff]  }
 0x143   : > { %2623 = vmatprep.subr.bf16.mxu1 %v4304_v61  ;;  %v4397_v61 = vld [vmem:[#allocation5 + $0x58c] ss:$16 sps:$4 sm:$0xff]  }
 0x145   : > { %2581 = vmatpush2.bf16.msra.mxu0 %v4299_v62  ;;  %v4392_v62 = vld [vmem:[#allocation5 + $0x388] ss:$16 sps:$4 sm:$0xff]  }
 0x146   : > { %2624 = vmatpush2.bf16.msra.mxu1 %v4302_v63  ;;  %2582 = vmatprep.subr.bf16.mxu0 %v4307_v0  ;;  %v4395_v63 = vld [vmem:[#allocation5 + $0x588] ss:$16 sps:$4 sm:$0xff]   ;;  %v4400_v0 = vld [vmem:[#allocation5 + $0x36c] ss:$16 sps:$4 sm:$0xff]  }
 0x147   : > { %2625 = vmatprep.subr.bf16.mxu1 %v4310_v1  ;;  %v4403_v1 = vld [vmem:[#allocation5 + $0x56c] ss:$16 sps:$4 sm:$0xff]  }
 0x149   : > { %2583 = vmatpush2.bf16.msra.mxu0 %v4305_v2  ;;  %v4398_v2 = vld [vmem:[#allocation5 + $0x368] ss:$16 sps:$4 sm:$0xff]  }
 0x14a   : > { %2626 = vmatpush2.bf16.msra.mxu1 %v4308_v3  ;;  %2584 = vmatprep.subr.bf16.mxu0 %v4313_v5  ;;  %v4401_v3 = vld [vmem:[#allocation5 + $0x568] ss:$16 sps:$4 sm:$0xff]   ;;  %v4406_v5 = vld [vmem:[#allocation5 + $0x34c] ss:$16 sps:$4 sm:$0xff]  }
 0x14b   : > { %2627 = vmatprep.subr.bf16.mxu1 %v4316_v6  ;;  %v4409_v6 = vld [vmem:[#allocation5 + $0x54c] ss:$16 sps:$4 sm:$0xff]  }
 0x14d   : > { %2585 = vmatpush2.bf16.msra.mxu0 %v4311_v7  ;;  %v4404_v7 = vld [vmem:[#allocation5 + $0x348] ss:$16 sps:$4 sm:$0xff]  }
 0x14e   : > { %2628 = vmatpush2.bf16.msra.mxu1 %v4314_v8  ;;  %2586 = vmatprep.subr.bf16.mxu0 %v4319_v9  ;;  %v4407_v8 = vld [vmem:[#allocation5 + $0x548] ss:$16 sps:$4 sm:$0xff]   ;;  %v4412_v9 = vld [vmem:[#allocation5 + $0x32c] ss:$16 sps:$4 sm:$0xff]  }
 0x14f   : > { %2629 = vmatprep.subr.bf16.mxu1 %v4322_v11  ;;  %v4415_v11 = vld [vmem:[#allocation5 + $0x52c] ss:$16 sps:$4 sm:$0xff]  }
 0x151   : > { %2587 = vmatpush2.bf16.msra.mxu0 %v4317_v12  ;;  %v4410_v12 = vld [vmem:[#allocation5 + $0x328] ss:$16 sps:$4 sm:$0xff]  }
 0x152   : > { %2630 = vmatpush2.bf16.msra.mxu1 %v4320_v13  ;;  %2642 = vmatprep.subr.bf16.mxu0 %v4328_v14  ;;  %v4413_v13 = vld [vmem:[#allocation5 + $0x528] ss:$16 sps:$4 sm:$0xff]   ;;  %v4418_v14 = vld [vmem:[#allocation5 + $0x30c] ss:$16 sps:$4 sm:$0xff]  }
 0x153   : > { %2685 = vmatprep.subr.bf16.mxu1 %v4331_v15  ;;  %v4421_v15 = vld [vmem:[#allocation5 + $0x50c] ss:$16 sps:$4 sm:$0xff]  }
 0x154   : > { %2589 = vmatmul.mubr.bf16.vlgmr.msra.gmra.mxu0 %v5094_v16 }
 0x155   : > { %2632 = vmatmul.mubr.bf16.vlgmr.msra.gmra.mxu1 %v5074_v4  ;;  %2643 = vmatpush1.bf16.msra.mxu0 %v4326_v17  ;;  %v4349_v4 = vld [vmem:[#allocation5 + $0x48c] ss:$16 sps:$4 sm:$0xff]   ;;  %v4416_v17 = vld [vmem:[#allocation5 + $0x308] ss:$16 sps:$4 sm:$0xff]  }
 0x156   : > { %2686 = vmatpush1.bf16.msra.mxu1 %v4329_v18  ;;  %2644 = vmatprep.subr.bf16.mxu0 %v4334_v19  ;;  %v4419_v18 = vld [vmem:[#allocation5 + $0x508] ss:$16 sps:$4 sm:$0xff]   ;;  %v4424_v19 = vld [vmem:[#allocation5 + $0x6ec] ss:$16 sps:$4 sm:$0xff]  }
 0x157   : > { %2687 = vmatprep.subr.bf16.mxu1 %v4337_v21  ;;  %2674 = vmatprep.mubr.bf16.mxu0 %v4558_v26  ;;  %v4427_v21 = vld [vmem:[#allocation5 + $0x8ec] ss:$16 sps:$4 sm:$0xff]   ;;  %v4559_v26 = vld [vmem:[%s5050_s20 + $0x8] ss:$40 sps:$4 sm:$0xff]  }
 0x158   : > { %2717 = vmatprep.mubr.bf16.mxu1 %v5079_v34  ;;  %v4353_v34 = vld [vmem:[#allocation5 + $0x468] ss:$16 sps:$4 sm:$0xff]  }
 0x159   : > { %2645 = vmatpush1.bf16.msra.mxu0 %v4332_v22  ;;  %v4422_v22 = vld [vmem:[#allocation5 + $0x6e8] ss:$16 sps:$4 sm:$0xff]  }
 0x15a   : > { %2688 = vmatpush1.bf16.msra.mxu1 %v4335_v23  ;;  %2646 = vmatprep.subr.bf16.mxu0 %v4340_v24  ;;  %v4425_v23 = vld [vmem:[#allocation5 + $0x8e8] ss:$16 sps:$4 sm:$0xff]   ;;  %v4430_v24 = vld [vmem:[#allocation5 + $0x6cc] ss:$16 sps:$4 sm:$0xff]  }
 0x15b   : > { %2689 = vmatprep.subr.bf16.mxu1 %v4343_v25  ;;  %v4433_v25 = vld [vmem:[#allocation5 + $0x8cc] ss:$16 sps:$4 sm:$0xff]  }
 0x15d   : > { %2647 = vmatpush1.bf16.msra.mxu0 %v4338_v27  ;;  %v4428_v27 = vld [vmem:[#allocation5 + $0x6c8] ss:$16 sps:$4 sm:$0xff]  }
 0x15e   : > { %2690 = vmatpush1.bf16.msra.mxu1 %v4341_v28  ;;  %2648 = vmatprep.subr.bf16.mxu0 %v4346_v29  ;;  %v4431_v28 = vld [vmem:[#allocation5 + $0x8c8] ss:$16 sps:$4 sm:$0xff]   ;;  %v4436_v29 = vld [vmem:[#allocation5 + $0x6ac] ss:$16 sps:$4 sm:$0xff]  }
 0x15f   : > { %2691 = vmatprep.subr.bf16.mxu1 %v4349_v4  ;;  %v4439_v4 = vld [vmem:[#allocation5 + $0x8ac] ss:$16 sps:$4 sm:$0xff]  }
 0x161   : > { %2649 = vmatpush1.bf16.msra.mxu0 %v4344_v49  ;;  %v4560_v49 = vld [vmem:[%s5050_s20 + $0x1c] ss:$40 sps:$4 sm:$0xff]  }
 0x162   : > { %2692 = vmatpush1.bf16.msra.mxu1 %v4347_v30  ;;  %2650 = vmatprep.subr.bf16.mxu0 %v4352_v31  ;;  %v4434_v30 = vld [vmem:[#allocation5 + $0x6a8] ss:$16 sps:$4 sm:$0xff]  }
 0x163   : > { %2693 = vmatprep.subr.bf16.mxu1 %v4355_v32  ;;  %v4437_v31 = vld [vmem:[#allocation5 + $0x8a8] ss:$16 sps:$4 sm:$0xff]   ;;  %v4442_v32 = vld [vmem:[#allocation5 + $0x68c] ss:$16 sps:$4 sm:$0xff]  }
 0x165   : > { %2651 = vmatpush1.bf16.msra.mxu0 %v4350_v33  ;;  %v4440_v33 = vld [vmem:[#allocation5 + $0x688] ss:$16 sps:$4 sm:$0xff]  }
 0x166   : > { %2694 = vmatpush1.bf16.msra.mxu1 %v4353_v34  ;;  %2652 = vmatprep.subr.bf16.mxu0 %v4358_v35  ;;  %v4443_v34 = vld [vmem:[#allocation5 + $0x888] ss:$16 sps:$4 sm:$0xff]   ;;  %v4448_v35 = vld [vmem:[#allocation5 + $0x66c] ss:$16 sps:$4 sm:$0xff]  }
 0x167   : > { %2695 = vmatprep.subr.bf16.mxu1 %v4361_v36  ;;  %v4451_v36 = vld [vmem:[#allocation5 + $0x86c] ss:$16 sps:$4 sm:$0xff]  }
 0x169   : > { %2653 = vmatpush1.bf16.msra.mxu0 %v4356_v37  ;;  %v4446_v37 = vld [vmem:[#allocation5 + $0x668] ss:$16 sps:$4 sm:$0xff]  }
 0x16a   : > { %2696 = vmatpush1.bf16.msra.mxu1 %v4359_v38  ;;  %2654 = vmatprep.subr.bf16.mxu0 %v4364_v39  ;;  %v4454_v38 = vld [vmem:[#allocation5 + $0x64c] ss:$16 sps:$4 sm:$0xff]  }
 0x16b   : > { %2697 = vmatprep.subr.bf16.mxu1 %v4367_v40  ;;  %v4457_v39 = vld [vmem:[#allocation5 + $0x84c] ss:$16 sps:$4 sm:$0xff]   ;;  %v4452_v40 = vld [vmem:[#allocation5 + $0x648] ss:$16 sps:$4 sm:$0xff]  }
 0x16d   : > { %2655 = vmatpush1.bf16.msra.mxu0 %v4362_v41  ;;  %v4455_v41 = vld [vmem:[#allocation5 + $0x848] ss:$16 sps:$4 sm:$0xff]  }
 0x16e   : > { %2698 = vmatpush1.bf16.msra.mxu1 %v4365_v42  ;;  %2656 = vmatprep.subr.bf16.mxu0 %v4370_v43  ;;  %v4460_v42 = vld [vmem:[#allocation5 + $0x62c] ss:$16 sps:$4 sm:$0xff]  }
 0x16f   : > { %2699 = vmatprep.subr.bf16.mxu1 %v4373_v44  ;;  %v4463_v43 = vld [vmem:[#allocation5 + $0x82c] ss:$16 sps:$4 sm:$0xff]   ;;  %v4458_v44 = vld [vmem:[#allocation5 + $0x628] ss:$16 sps:$4 sm:$0xff]  }
 0x171   : > { %2657 = vmatpush1.bf16.msra.mxu0 %v4368_v45  ;;  %v4461_v45 = vld [vmem:[#allocation5 + $0x828] ss:$16 sps:$4 sm:$0xff]  }
 0x172   : > { %2700 = vmatpush1.bf16.msra.mxu1 %v4371_v46  ;;  %2658 = vmatprep.subr.bf16.mxu0 %v4376_v47  ;;  %v4466_v46 = vld [vmem:[#allocation5 + $0x60c] ss:$16 sps:$4 sm:$0xff]  }
 0x173   : > { %2701 = vmatprep.subr.bf16.mxu1 %v4379_v48  ;;  %v4469_v47 = vld [vmem:[#allocation5 + $0x80c] ss:$16 sps:$4 sm:$0xff]   ;;  %v4464_v48 = vld [vmem:[#allocation5 + $0x608] ss:$16 sps:$4 sm:$0xff]  }
 0x175   : > { %2659 = vmatpush2.bf16.msra.mxu0 %v4374_v50  ;;  %v4467_v50 = vld [vmem:[#allocation5 + $0x808] ss:$16 sps:$4 sm:$0xff]  }
 0x176   : > { %2702 = vmatpush2.bf16.msra.mxu1 %v4377_v51  ;;  %2660 = vmatprep.subr.bf16.mxu0 %v4382_v52  ;;  %v4472_v51 = vld [vmem:[#allocation5 + $0x7ec] ss:$16 sps:$4 sm:$0xff]  }
 0x177   : > { %2703 = vmatprep.subr.bf16.mxu1 %v4385_v53  ;;  %v4475_v52 = vld [vmem:[#allocation5 + $0x9ec] ss:$16 sps:$4 sm:$0xff]   ;;  %v4470_v53 = vld [vmem:[#allocation5 + $0x7e8] ss:$16 sps:$4 sm:$0xff]  }
 0x179   : > { %2661 = vmatpush2.bf16.msra.mxu0 %v4380_v54  ;;  %v4473_v54 = vld [vmem:[#allocation5 + $0x9e8] ss:$16 sps:$4 sm:$0xff]  }
 0x17a   : > { %2704 = vmatpush2.bf16.msra.mxu1 %v4383_v55  ;;  %2662 = vmatprep.subr.bf16.mxu0 %v4388_v56  ;;  %v4478_v55 = vld [vmem:[#allocation5 + $0x7cc] ss:$16 sps:$4 sm:$0xff]  }
 0x17b   : > { %2705 = vmatprep.subr.bf16.mxu1 %v4391_v57  ;;  %v4481_v56 = vld [vmem:[#allocation5 + $0x9cc] ss:$16 sps:$4 sm:$0xff]   ;;  %v4476_v57 = vld [vmem:[#allocation5 + $0x7c8] ss:$16 sps:$4 sm:$0xff]  }
 0x17d   : > { %2663 = vmatpush2.bf16.msra.mxu0 %v4386_v58  ;;  %v4479_v58 = vld [vmem:[#allocation5 + $0x9c8] ss:$16 sps:$4 sm:$0xff]  }
 0x17e   : > { %2706 = vmatpush2.bf16.msra.mxu1 %v4389_v59  ;;  %2664 = vmatprep.subr.bf16.mxu0 %v4394_v60  ;;  %v4484_v59 = vld [vmem:[#allocation5 + $0x7ac] ss:$16 sps:$4 sm:$0xff]  }
 0x17f   : > { %2707 = vmatprep.subr.bf16.mxu1 %v4397_v61  ;;  %v4487_v60 = vld [vmem:[#allocation5 + $0x9ac] ss:$16 sps:$4 sm:$0xff]   ;;  %v4482_v61 = vld [vmem:[#allocation5 + $0x7a8] ss:$16 sps:$4 sm:$0xff]  }
 0x181   : > { %2665 = vmatpush2.bf16.msra.mxu0 %v4392_v62  ;;  %v4485_v62 = vld [vmem:[#allocation5 + $0x9a8] ss:$16 sps:$4 sm:$0xff]  }
 0x182   : > { %2708 = vmatpush2.bf16.msra.mxu1 %v4395_v63  ;;  %2666 = vmatprep.subr.bf16.mxu0 %v4400_v0  ;;  %v4490_v63 = vld [vmem:[#allocation5 + $0x78c] ss:$16 sps:$4 sm:$0xff]  }
 0x183   : > { %2709 = vmatprep.subr.bf16.mxu1 %v4403_v1  ;;  %v4493_v0 = vld [vmem:[#allocation5 + $0x98c] ss:$16 sps:$4 sm:$0xff]   ;;  %v4488_v1 = vld [vmem:[#allocation5 + $0x788] ss:$16 sps:$4 sm:$0xff]  }
 0x185   : > { %2667 = vmatpush2.bf16.msra.mxu0 %v4398_v2  ;;  %v4491_v2 = vld [vmem:[#allocation5 + $0x988] ss:$16 sps:$4 sm:$0xff]  }
 0x186   : > { %2710 = vmatpush2.bf16.msra.mxu1 %v4401_v3  ;;  %2668 = vmatprep.subr.bf16.mxu0 %v4406_v5  ;;  %v4496_v3 = vld [vmem:[#allocation5 + $0x76c] ss:$16 sps:$4 sm:$0xff]  }
 0x187   : > { %2711 = vmatprep.subr.bf16.mxu1 %v4409_v6  ;;  %v4499_v5 = vld [vmem:[#allocation5 + $0x96c] ss:$16 sps:$4 sm:$0xff]   ;;  %v4494_v6 = vld [vmem:[#allocation5 + $0x768] ss:$16 sps:$4 sm:$0xff]  }
 0x189   : > { %2669 = vmatpush2.bf16.msra.mxu0 %v4404_v7  ;;  %v4497_v7 = vld [vmem:[#allocation5 + $0x968] ss:$16 sps:$4 sm:$0xff]  }
 0x18a   : > { %2712 = vmatpush2.bf16.msra.mxu1 %v4407_v8  ;;  %2670 = vmatprep.subr.bf16.mxu0 %v4412_v9  ;;  %v4502_v8 = vld [vmem:[#allocation5 + $0x74c] ss:$16 sps:$4 sm:$0xff]  }
 0x18b   : > { %2713 = vmatprep.subr.bf16.mxu1 %v4415_v11  ;;  %v4505_v9 = vld [vmem:[#allocation5 + $0x94c] ss:$16 sps:$4 sm:$0xff]   ;;  %v4500_v11 = vld [vmem:[#allocation5 + $0x748] ss:$16 sps:$4 sm:$0xff]  }
 0x18d   : > { %2671 = vmatpush2.bf16.msra.mxu0 %v4410_v12  ;;  %v4503_v12 = vld [vmem:[#allocation5 + $0x948] ss:$16 sps:$4 sm:$0xff]  }
 0x18e   : > { %2714 = vmatpush2.bf16.msra.mxu1 %v4413_v13  ;;  %2672 = vmatprep.subr.bf16.mxu0 %v4418_v14  ;;  %v4508_v13 = vld [vmem:[#allocation5 + $0x72c] ss:$16 sps:$4 sm:$0xff]  }
 0x18f   : > { %2715 = vmatprep.subr.bf16.mxu1 %v4421_v15  ;;  %v4511_v14 = vld [vmem:[#allocation5 + $0x92c] ss:$16 sps:$4 sm:$0xff]   ;;  %v4506_v15 = vld [vmem:[#allocation5 + $0x728] ss:$16 sps:$4 sm:$0xff]  }
 0x191   : > { %2673 = vmatpush2.bf16.msra.mxu0 %v4416_v17  ;;  %v4509_v17 = vld [vmem:[#allocation5 + $0x928] ss:$16 sps:$4 sm:$0xff]  }
 0x192   : > { %2716 = vmatpush2.bf16.msra.mxu1 %v4419_v18  ;;  %2728 = vmatprep.subr.bf16.mxu0 %v4424_v19  ;;  %v4514_v18 = vld [vmem:[#allocation5 + $0x70c] ss:$16 sps:$4 sm:$0xff]  }
 0x193   : > { %2771 = vmatprep.subr.bf16.mxu1 %v4427_v21  ;;  %v4517_v19 = vld [vmem:[#allocation5 + $0x90c] ss:$16 sps:$4 sm:$0xff]   ;;  %v4512_v21 = vld [vmem:[#allocation5 + $0x708] ss:$16 sps:$4 sm:$0xff]  }
 0x194   : > { %2675 = vmatmul.mubr.bf16.vlgmr.msra.gmra.mxu0 %v4559_v26  ;;  %v4561_v26 = vld [vmem:[%s5050_s20 + $0x18] ss:$40 sps:$4 sm:$0xff]  }
 0x195   : > { %2718 = vmatmul.mubr.bf16.vlgmr.msra.gmra.mxu1 %v5084_v10  ;;  %2729 = vmatpush1.bf16.msra.mxu0 %v4422_v22  ;;  %v4445_v10 = vld [vmem:[#allocation5 + $0x88c] ss:$16 sps:$4 sm:$0xff]   ;;  %v4515_v22 = vld [vmem:[#allocation5 + $0x908] ss:$16 sps:$4 sm:$0xff]  }
 0x196   : > { %2772 = vmatpush1.bf16.msra.mxu1 %v4425_v23  ;;  %2730 = vmatprep.subr.bf16.mxu0 %v4430_v24  ;;  %v4518_v23 = vld [vmem:[#allocation8 + $0x78] sm:$0xff]  }
 0x197   : > { %2773 = vmatprep.subr.bf16.mxu1 %v4433_v25  ;;  %2760 = vmatprep.mubr.bf16.mxu0 %v4560_v49  ;;  %v4519_v24 = vld [vmem:[#allocation8 + $0x38] sm:$0xff]   ;;  %v4520_v25 = vld [vmem:[#allocation8 + $0x70] sm:$0xff]   ;;  %v4525_v49 = vld [vmem:[#allocation8 + $0x20] sm:$0xff]  }
 0x198   : > { %2803 = vmatprep.mubr.bf16.mxu1 %v5089_v20  ;;  %v4449_v20 = vld [vmem:[#allocation5 + $0x868] ss:$16 sps:$4 sm:$0xff]  }
 0x199   : > { %2731 = vmatpush1.bf16.msra.mxu0 %v4428_v27  ;;  %v4521_v27 = vld [vmem:[#allocation8 + $0x30] sm:$0xff]  }
 0x19a   : > { %2774 = vmatpush1.bf16.msra.mxu1 %v4431_v28  ;;  %2732 = vmatprep.subr.bf16.mxu0 %v4436_v29  ;;  %v4522_v28 = vld [vmem:[#allocation8 + $0x68] sm:$0xff]  }
 0x19b   : > { %2775 = vmatprep.subr.bf16.mxu1 %v4439_v4  ;;  %v4523_v29 = vld [vmem:[#allocation8 + $0x28] sm:$0xff]   ;;  %v4524_v4 = vld [vmem:[#allocation8 + $0x60] sm:$0xff]  }
 0x19d   : > { %2733 = vmatpush1.bf16.msra.mxu0 %v4434_v30  ;;  %v4534_v30 = vld [vmem:[#allocation8 + $0xf8] sm:$0xff]  }
 0x19e   : > { %2776 = vmatpush1.bf16.msra.mxu1 %v4437_v31  ;;  %2734 = vmatprep.subr.bf16.mxu0 %v4442_v32  ;;  %v4535_v31 = vld [vmem:[#allocation8 + $0xb8] sm:$0xff]   ;;  %v4536_v32 = vld [vmem:[#allocation8 + $0xf0] sm:$0xff]  }
 0x19f   : > { %2777 = vmatprep.subr.bf16.mxu1 %v4445_v10  ;;  %v4526_v10 = vld [vmem:[#allocation8 + $0x58] sm:$0xff]  }
 0x1a1   : > { %2735 = vmatpush1.bf16.msra.mxu0 %v4440_v33  ;;  %v4537_v33 = vld [vmem:[#allocation8 + $0xb0] sm:$0xff]  }
 0x1a2   : > { %2778 = vmatpush1.bf16.msra.mxu1 %v4443_v34  ;;  %2736 = vmatprep.subr.bf16.mxu0 %v4448_v35  ;;  %v4538_v34 = vld [vmem:[#allocation8 + $0xe8] sm:$0xff]   ;;  %v4528_v35 = vld [vmem:[#allocation8 + $0x50] sm:$0xff]  }
 0x1a3   : > { %2779 = vmatprep.subr.bf16.mxu1 %v4451_v36  ;;  %v4539_v36 = vld [vmem:[#allocation8 + $0xa8] sm:$0xff]  }
 0x1a5   : > { %2737 = vmatpush1.bf16.msra.mxu0 %v4446_v37  ;;  %v4529_v37 = vld [vmem:[#allocation8 + $0x10] sm:$0xff]  }
 0x1a6   : > { %2780 = vmatpush1.bf16.msra.mxu1 %v4449_v20  ;;  %2738 = vmatprep.subr.bf16.mxu0 %v4454_v38  ;;  %v4540_v20 = vld [vmem:[#allocation8 + $0xe0] sm:$0xff]   ;;  %v4530_v38 = vld [vmem:[#allocation8 + $0x48] sm:$0xff]  }
 0x1a7   : > { %2781 = vmatprep.subr.bf16.mxu1 %v4457_v39  ;;  %v4541_v39 = vld [vmem:[#allocation8 + $0xa0] sm:$0xff]  }
 0x1a9   : > { %2739 = vmatpush1.bf16.msra.mxu0 %v4452_v40  ;;  %v4531_v40 = vld [vmem:[#allocation8 + $0x8] sm:$0xff]  }
 0x1aa   : > { %2782 = vmatpush1.bf16.msra.mxu1 %v4455_v41  ;;  %2740 = vmatprep.subr.bf16.mxu0 %v4460_v42  ;;  %v4532_v41 = vld [vmem:[#allocation8 + $0x40] sm:$0xff]  }
 0x1ab   : > { %2783 = vmatprep.subr.bf16.mxu1 %v4463_v43  ;;  %v4533_v42 = vld [vmem:[#allocation8] sm:$0xff]   ;;  %v2418_v43 = vpop.f32.mrf.mxu0 }
 0x1ad   : > { %2741 = vmatpush1.bf16.msra.mxu0 %v4458_v44  ;;  %v2420_v44 = vpop.f32.mrf.mxu0 }
 0x1ae   : > { %2784 = vmatpush1.bf16.msra.mxu1 %v4461_v45  ;;  %2742 = vmatprep.subr.bf16.mxu0 %v4466_v46  ;;  %v714_v45 = vlaneseq  ;;  %v2461_v46 = vpop.f32.mrf.mxu1 }
 0x1af   : > { %2785 = vmatprep.subr.bf16.mxu1 %v4469_v47  ;;  %v2422_v47 = vpop.f32.mrf.mxu0 }
 0x1b1   : > { %2743 = vmatpush1.bf16.msra.mxu0 %v4464_v48  ;;  %v5106_v48 = vshrl.u32 %v714_v45, 7 }
 0x1b2   : > { %2786 = vmatpush1.bf16.msra.mxu1 %v4467_v50  ;;  %2744 = vmatprep.subr.bf16.mxu0 %v4472_v51  ;;  %v2463_v50 = vpop.f32.mrf.mxu1  ;;  %v2424_v51 = vpop.f32.mrf.mxu0 }
 0x1b3   : > { %2787 = vmatprep.subr.bf16.mxu1 %v4475_v52  ;;  %v720_v52 = vsub.s32 1, %v5106_v48 }
 0x1b5   : > { %2745 = vmatpush2.bf16.msra.mxu0 %v4470_v53  ;;  %v5109_v53 = vld [vmem:[#allocation7] sm:$0xf] }
 0x1b6   : > { %2788 = vmatpush2.bf16.msra.mxu1 %v4473_v54  ;;  %2746 = vmatprep.subr.bf16.mxu0 %v4478_v55  ;;  %v716_v54 = vsub.s32 0, %v5106_v48  ;;  %v2465_v55 = vpop.f32.mrf.mxu1 }
 0x1b7   : > { %2789 = vmatprep.subr.bf16.mxu1 %v4481_v56 }
 0x1b9   : > { %2747 = vmatpush2.bf16.msra.mxu0 %v4476_v57  ;;  %v721_v57 = vrot.slane %v5109_v53, %v720_v52 }
 0x1ba   : > { %2790 = vmatpush2.bf16.msra.mxu1 %v4479_v58  ;;  %2748 = vmatprep.subr.bf16.mxu0 %v4484_v59  ;;  %v717_v58 = vrot.slane %v5109_v53, %v716_v54  ;;  %v2467_v59 = vpop.f32.mrf.mxu1  ;;  %v728_v54 = vsub.s32 3, %v5106_v48 }
 0x1bb   : > { %2791 = vmatprep.subr.bf16.mxu1 %v4487_v60 }
 0x1bd   : > { %2749 = vmatpush2.bf16.msra.mxu0 %v4482_v61 }
 0x1be   : > { %2792 = vmatpush2.bf16.msra.mxu1 %v4485_v62  ;;  %2750 = vmatprep.subr.bf16.mxu0 %v4490_v63  ;;  %v2421_v62 = vadd.f32 %v2420_v44, %v721_v57  ;;  %v2423_v63 = vadd.f32 %v2422_v47, %v717_v58  ;;  %v4553_v44 = vld [vmem:[#allocation11 + $0x20] sm:$0xff]  }
 0x1bf   : > { %2793 = vmatprep.subr.bf16.mxu1 %v4493_v0  ;;  %v2419_v0 = vadd.f32 %v2418_v43, %v717_v58  ;;  %v4552_v43 = vld [vmem:[#allocation11 + $0x28] sm:$0xff]   ;;  %v729_v58 = vrot.slane %v5109_v53, %v728_v54 }
 0x1c1   : > { %2751 = vmatpush2.bf16.msra.mxu0 %v4488_v1 }
 0x1c2   : > { %2794 = vmatpush2.bf16.msra.mxu1 %v4491_v2  ;;  %2752 = vmatprep.subr.bf16.mxu0 %v4496_v3  ;;  %v2425_v2 = vadd.f32 %v2424_v51, %v721_v57 }
 0x1c3   : > { %2795 = vmatprep.subr.bf16.mxu1 %v4499_v5  ;;  %v2464_v5 = vadd.f32 %v2463_v50, %v2421_v62 }
 0x1c5   : > { %2753 = vmatpush2.bf16.msra.mxu0 %v4494_v6  ;;  %v2466_v6 = vadd.f32 %v2465_v55, %v2423_v63  ;;  %v724_v55 = vsub.s32 2, %v5106_v48 }
 0x1c6   : > { %2796 = vmatpush2.bf16.msra.mxu1 %v4497_v7  ;;  %2754 = vmatprep.subr.bf16.mxu0 %v4502_v8  ;;  %v2462_v7 = vadd.f32 %v2461_v46, %v2419_v0 }
 0x1c7   : > { %2797 = vmatprep.subr.bf16.mxu1 %v4505_v9  ;;  %v4542_v9 = vld [vmem:[#allocation8 + $0xd8] sm:$0xff]  }
 0x1c9   : > { %2755 = vmatpush2.bf16.msra.mxu0 %v4500_v11  ;;  %v2468_v11 = vadd.f32 %v2467_v59, %v2425_v2  ;;  %v725_v59 = vrot.slane %v5109_v53, %v724_v55 }
 0x1ca   : > { %2798 = vmatpush2.bf16.msra.mxu1 %v4503_v12  ;;  %2756 = vmatprep.subr.bf16.mxu0 %v4508_v13 }
 0x1cb   : > { %2799 = vmatprep.subr.bf16.mxu1 %v4511_v14  ;;  %v4543_v14 = vld [vmem:[#allocation8 + $0x98] sm:$0xff]  }
 0x1cd   : > { %2757 = vmatpush2.bf16.msra.mxu0 %v4506_v15 }
 0x1ce   : > { %2800 = vmatpush2.bf16.msra.mxu1 %v4509_v17  ;;  %2758 = vmatprep.subr.bf16.mxu0 %v4514_v18 }
 0x1cf   : > { %2801 = vmatprep.subr.bf16.mxu1 %v4517_v19 }
 0x1d1   : > { %2759 = vmatpush2.bf16.msra.mxu0 %v4512_v21 }
 0x1d2   : > { %2802 = vmatpush2.bf16.msra.mxu1 %v4515_v22  ;;  %3830 = vmatprep.subr.bf16.mxu0 %v4518_v23  ;;  %v4544_v22 = vld [vmem:[#allocation8 + $0xd0] sm:$0xff]  }
 0x1d3   : > { %3852 = vmatprep.subr.bf16.mxu1 %v4534_v30 }
 0x1d4   : > { %2761 = vmatmul.mubr.bf16.vlgmr.msra.gmra.mxu0 %v4561_v26  ;;  %v2504_v56 = vpop.f32.mrf.mxu0 }
 0x1d5   : > { %2804 = vmatmul.mubr.bf16.vlgmr.msra.gmra.mxu1 %v5094_v16  ;;  %3831 = vmatpush3.bf16.msra.mxu0 %v4519_v24  ;;  %v4527_v16 = vld [vmem:[#allocation8 + $0x18] sm:$0xff]   ;;  %v2547_v61 = vpop.f32.mrf.mxu1  ;;  %v2505_v15 = vadd.f32 %v2504_v56, %v2462_v7 }
 0x1d6   : > { %3832 = vmatprep.subr.bf16.mxu0 %v4520_v25  ;;  %3853 = vmatpush3.bf16.msra.mxu1 %v4535_v31  ;;  %v2506_v60 = vpop.f32.mrf.mxu0  ;;  %v4545_v25 = vld [vmem:[#allocation8 + $0x90] sm:$0xff]  }
 0x1d7   : > { %3854 = vmatprep.subr.bf16.mxu1 %v4536_v32  ;;  %v2549_v3 = vpop.f32.mrf.mxu1  ;;  %v2507_v12 = vadd.f32 %v2506_v60, %v2464_v5  ;;  %v2548_v26 = vadd.f32 %v2547_v61, %v2505_v15  ;;  %v4546_v32 = vld [vmem:[#allocation8 + $0xc8] sm:$0xff]  }
 0x1d8   : > { %v2508_v1 = vpop.f32.mrf.mxu0 }
 0x1d9   : > { %3833 = vmatpush3.bf16.msra.mxu0 %v4521_v27  ;;  %v2509_v13 = vadd.f32 %v2508_v1, %v2466_v6  ;;  %v2551_v17 = vpop.f32.mrf.mxu1  ;;  %v2550_v23 = vadd.f32 %v2549_v3, %v2507_v12 }
 0x1da   : > { %3834 = vmatprep.subr.bf16.mxu0 %v4522_v28  ;;  %3855 = vmatpush3.bf16.msra.mxu1 %v4537_v33  ;;  %v2510_v8 = vpop.f32.mrf.mxu0  ;;  %v4547_v33 = vld [vmem:[#allocation8 + $0x88] sm:$0xff]  }
 0x1db   : > { %3856 = vmatprep.subr.bf16.mxu1 %v4538_v34  ;;  %v2511_v19 = vadd.f32 %v2510_v8, %v2468_v11  ;;  %v2552_v24 = vadd.f32 %v2551_v17, %v2509_v13  ;;  %v2553_v27 = vpop.f32.mrf.mxu1 }
 0x1dd   : > { %3835 = vmatpush3.bf16.msra.mxu0 %v4523_v29  ;;  %v2554_v29 = vadd.f32 %v2553_v27, %v2511_v19 }
 0x1de   : > { %3836 = vmatprep.subr.bf16.mxu0 %v4524_v4  ;;  %3857 = vmatpush3.bf16.msra.mxu1 %v4539_v36 }
 0x1df   : > { %3858 = vmatprep.subr.bf16.mxu1 %v4540_v20 }
 0x1e1   : > { %3837 = vmatpush3.bf16.msra.mxu0 %v4525_v49 }
 0x1e2   : > { %3838 = vmatprep.subr.bf16.mxu0 %v4526_v10  ;;  %3859 = vmatpush3.bf16.msra.mxu1 %v4541_v39 }
 0x1e3   : > { %3860 = vmatprep.subr.bf16.mxu1 %v4542_v9 }
 0x1e5   : > { %3839 = vmatpush3.bf16.msra.mxu0 %v4527_v16 }
 0x1e6   : > { %3840 = vmatprep.subr.bf16.mxu0 %v4528_v35  ;;  %3861 = vmatpush3.bf16.msra.mxu1 %v4543_v14 }
 0x1e7   : > { %3862 = vmatprep.subr.bf16.mxu1 %v4544_v22 }
 0x1e9   : > { %3841 = vmatpush3.bf16.msra.mxu0 %v4529_v37  ;;  %v4548_v37 = vld [vmem:[#allocation8 + $0xc0] sm:$0xff]  }
 0x1ea   : > { %3842 = vmatprep.subr.bf16.mxu0 %v4530_v38  ;;  %3863 = vmatpush3.bf16.msra.mxu1 %v4545_v25  ;;  %v4549_v38 = vld [vmem:[#allocation8 + $0x80] sm:$0xff]  }
 0x1eb   : > { %3864 = vmatprep.subr.bf16.mxu1 %v4546_v32 }
 0x1ed   : > { %3843 = vmatpush3.bf16.msra.mxu0 %v4531_v40  ;;  %v4550_v40 = vld [vmem:[#allocation11 + $0x38] sm:$0xff]  }
 0x1ee   : > { %3844 = vmatprep.subr.bf16.mxu0 %v4532_v41  ;;  %3865 = vmatpush3.bf16.msra.mxu1 %v4547_v33  ;;  %v4837_v41 = vmov 0.0   ;;  %v4554_v33 = vld [vmem:[#allocation11 + $0x18] sm:$0xff]  }
 0x1ef   : > { %3866 = vmatprep.subr.bf16.mxu1 %v4548_v37 }
 0x1f1   : > { %3845 = vmatpush3.bf16.msra.mxu0 %v4533_v42  ;;  %v4551_v42 = vld [vmem:[#allocation11 + $0x30] sm:$0xff]  }
 0x1f2   : > { %3867 = vmatpush3.bf16.msra.mxu1 %v4549_v38  ;;  %3883 = vmatprep.subr.bf16.mxu0 %v4837_v41 }
 0x214   : > { %v2590_v18 = vpop.f32.mrf.mxu0 }
 0x215   : > { %v2591_v30 = vadd.f32 %v2590_v18, %v2548_v26  ;;  %v2633_v45 = vpop.f32.mrf.mxu1 }
 0x216   : > { %v2592_v21 = vpop.f32.mrf.mxu0  ;;  %v2634_v63 = vadd.f32 %v2633_v45, %v725_v59 }
 0x217   : > { %v2593_v4 = vadd.f32 %v2592_v21, %v2550_v23  ;;  %v2814_v36 = vmax.f32 %v2591_v30, 0.0  ;;  %v2635_v46 = vpop.f32.mrf.mxu1 }
 0x218   : > { %v2594_v28 = vpop.f32.mrf.mxu0  ;;  %v2636_v62 = vadd.f32 %v2635_v46, %v729_v58 }
 0x219   : > { %v2595_v49 = vadd.f32 %v2594_v28, %v2552_v24  ;;  %v2815_v34 = vmax.f32 %v2593_v4, 0.0  ;;  %v2637_v47 = vpop.f32.mrf.mxu1 }
 0x21a   : > { %v2596_v31 = vpop.f32.mrf.mxu0  ;;  %v2638_v0 = vadd.f32 %v2637_v47, %v725_v59 }
 0x21b   : > { %v2597_v10 = vadd.f32 %v2596_v31, %v2554_v29  ;;  %v2818_v16 = vmax.f32 %v2595_v49, 0.0  ;;  %v2639_v50 = vpop.f32.mrf.mxu1 }
 0x21c   : > { %v2640_v6 = vadd.f32 %v2639_v50, %v729_v58  ;;  %v3815_v58 = vld [vmem:[#allocation13] ss:$0 sm:$0xff] }
 0x21d   : > { %v2819_v35 = vmax.f32 %v2597_v10, 0.0  ;;  %v2822_v39 = vpack.c.bf16 %v2818_v16, %v2814_v36  ;;  %v4555_v16 = vld [vmem:[#allocation11 + $0x10] sm:$0xff]  }
 0x21f   : > { %v2823_v20 = vpack.c.bf16 %v2819_v35, %v2815_v34  ;;  %v4556_v34 = vld [vmem:[#allocation11 + $0x8] sm:$0xff]   ;;  %v4557_v35 = vld [vmem:[#allocation11] sm:$0xff]  }
 0x221   : > { %3121 = vmatprep.mubr.bf16.mxu0 %v2823_v20 }
 0x222   : > { %3122 = vmatmul.mubr.bf16.vlgmr.msra.gmra.mxu0 %v2822_v39 }
 0x223   : > { %3884 = vmatpush3.bf16.msra.mxu0 %v4550_v40  ;;  %3899 = vmatprep.mubr.msk.bf16.mxu0 %vm4838_vm0, %v4837_v41 }
 0x224   : > { %3885 = vmatprep.subr.bf16.mxu0 %v4837_v41 }
 0x227   : > { %3886 = vmatpush3.bf16.msra.mxu0 %v4551_v42  ;;  %v3782_v42 = vld [vmem:[#allocation10] ss:$0 sm:$0xff] }
 0x228   : > { %3887 = vmatprep.subr.bf16.mxu0 %v4837_v41 }
 0x22b   : > { %3888 = vmatpush3.bf16.msra.mxu0 %v4552_v43 }
 0x22c   : > { %3889 = vmatprep.subr.bf16.mxu0 %v4837_v41 }
 0x22f   : > { %3890 = vmatpush3.bf16.msra.mxu0 %v4553_v44 }
 0x230   : > { %3891 = vmatprep.subr.bf16.mxu0 %v4837_v41 }
 0x233   : > { %3892 = vmatpush3.bf16.msra.mxu0 %v4554_v33 }
 0x234   : > { %3893 = vmatprep.subr.bf16.mxu0 %v4837_v41 }
 0x237   : > { %3894 = vmatpush3.bf16.msra.mxu0 %v4555_v16 }
 0x238   : > { %3895 = vmatprep.subr.bf16.mxu0 %v4837_v41 }
 0x23b   : > { %3896 = vmatpush3.bf16.msra.mxu0 %v4556_v34 }
 0x23c   : > { %3897 = vmatprep.subr.bf16.mxu0 %v4837_v41 }
 0x23f   : > { %3898 = vmatpush3.bf16.msra.mxu0 %v4557_v35 }
 0x254   : > { %v2676_v51 = vpop.f32.mrf.mxu0 }
 0x255   : > { %v2719_v52 = vpop.f32.mrf.mxu1  ;;  %v2677_v2 = vadd.f32 %v2676_v51, %v2634_v63 }
 0x256   : > { %v2678_v56 = vpop.f32.mrf.mxu0 }
 0x257   : > { %v2721_v57 = vpop.f32.mrf.mxu1  ;;  %v2679_v1 = vadd.f32 %v2678_v56, %v2636_v62  ;;  %v2720_v12 = vadd.f32 %v2719_v52, %v2677_v2 }
 0x258   : > { %v2680_v60 = vpop.f32.mrf.mxu0 }
 0x259   : > { %v2723_v61 = vpop.f32.mrf.mxu1  ;;  %v2681_v7 = vadd.f32 %v2680_v60, %v2638_v0  ;;  %v2722_v48 = vadd.f32 %v2721_v57, %v2679_v1 }
 0x25a   : > { %v2682_v3 = vpop.f32.mrf.mxu0 }
 0x25b   : > { %v2725_v5 = vpop.f32.mrf.mxu1  ;;  %v2683_v11 = vadd.f32 %v2682_v3, %v2640_v6  ;;  %v2724_v15 = vadd.f32 %v2723_v61, %v2681_v7 }
 0x25d   : > { %v2726_v21 = vadd.f32 %v2725_v5, %v2683_v11 }
 0x294   : > { %v2762_v8 = vpop.f32.mrf.mxu0 }
 0x295   : > { %v2805_v9 = vpop.f32.mrf.mxu1  ;;  %v2763_v17 = vadd.f32 %v2762_v8, %v2720_v12 }
 0x296   : > { %v2764_v13 = vpop.f32.mrf.mxu0 }
 0x297   : > { %v2807_v14 = vpop.f32.mrf.mxu1  ;;  %v2765_v53 = vadd.f32 %v2764_v13, %v2722_v48  ;;  %v2806_v27 = vadd.f32 %v2805_v9, %v2763_v17 }
 0x298   : > { %v2766_v18 = vpop.f32.mrf.mxu0 }
 0x299   : > { %v2809_v19 = vpop.f32.mrf.mxu1  ;;  %v2767_v22 = vadd.f32 %v2766_v18, %v2724_v15  ;;  %v2808_v24 = vadd.f32 %v2807_v14, %v2765_v53  ;;  %v2816_v31 = vmax.f32 %v2806_v27, 0.0 }
 0x29a   : > { %v2768_v23 = vpop.f32.mrf.mxu0 }
 0x29b   : > { %v2810_v25 = vadd.f32 %v2809_v19, %v2767_v22  ;;  %v2769_v26 = vadd.f32 %v2768_v23, %v2726_v21  ;;  %v2811_v28 = vpop.f32.mrf.mxu1  ;;  %v2817_v49 = vmax.f32 %v2808_v24, 0.0 }
 0x29d   : > { %v2812_v29 = vadd.f32 %v2811_v28, %v2769_v26  ;;  %v2820_v4 = vmax.f32 %v2810_v25, 0.0 }
 0x29f   : > { %v2821_v30 = vmax.f32 %v2812_v29, 0.0  ;;  %v2824_v10 = vpack.c.bf16 %v2820_v4, %v2816_v31 }
 0x2a1   : > { %v2825_v32 = vpack.c.bf16 %v2821_v30, %v2817_v49 }
 0x2a3   : > { %3162 = vmatprep.mubr.bf16.mxu1 %v2825_v32 }
 0x2a4   : > { %3163 = vmatmul.mubr.bf16.vlgmr.msra.gmra.mxu1 %v2824_v10 }
 0x2e2   : > { %v3846_v36 = vpop.f32.mrf.mxu0 }
 0x2e4   : > { %v3847_v37 = vpop.f32.mrf.mxu0 }
 0x2e5   : > { %v3848_v40 = vadd.f32 %v3847_v37, %v3846_v36 }
 0x2e6   : > { %v3849_v20 = vpop.f32.mrf.mxu0 }
 0x2e7   : > { %v3124_v47 = vadd.f32 %v3848_v40, %v3782_v42 }
 0x2e8   : > { %v3850_v38 = vpop.f32.mrf.mxu0 }
 0x2e9   : > { %v3851_v44 = vadd.f32 %v3850_v38, %v3849_v20 }
 0x2eb   : > { %v3127_v51 = vadd.f32 %v3851_v44, %v3782_v42 }
 0x364   : > { %v3868_v39 = vpop.f32.mrf.mxu1 }
 0x366   : > { %v3869_v43 = vpop.f32.mrf.mxu1 }
 0x367   : > { %v3870_v45 = vadd.f32 %v3869_v43, %v3868_v39 }
 0x368   : > { %v3871_v46 = vpop.f32.mrf.mxu1 }
 0x369   : > { %v3165_v52 = vadd.f32 %v3870_v45, %v3124_v47 }
 0x36a   : > { %v3872_v50 = vpop.f32.mrf.mxu1 }
 0x36b   : > { %v3873_v54 = vadd.f32 %v3872_v50, %v3871_v46  ;;  %v3171_v41 = vmax.f32 %v3165_v52, 0.0 }
 0x36d   : > { %v3168_v55 = vadd.f32 %v3873_v54, %v3127_v51 }
 0x36f   : > { %v3172_v56 = vmax.f32 %v3168_v55, 0.0 }
 0x371   : > { %v3173_v57 = vpack.c.bf16 %v3172_v56, %v3171_v41 }
 0x373   : > { %3900 = vmatmul.mubr.bf16.vlgmr.msra.gmra.mxu0 %v3173_v57 }
 0x433   : > { %v3279_v59 = vpop.f32.mrf.mxu0 }
 0x434   : > { %v3280_v60 = vadd.f32 %v3815_v58, %v3279_v59 }
 0x435   : > { %v3901_v61 = vpop.f32.mrf.mxu0 }
 0x436   : > { %3286 = vst [vmem:[%s378_s19] sm:$0xff] %v3280_v60 }
 0x437   : > { %v3282_v62 = vpop.f32.mrf.mxu0 }
 0x438   : > { %v3283_v63 = vadd.f32 %v3815_v58, %v3282_v62 }
 0x439   : > { %v3902_v0 = vpop.f32.mrf.mxu0 }
 0x43a   : > { %3287 = vst [vmem:[%s378_s19 + $0x8] sm:$0xff] %v3283_v63 }
 0x43b   : > { %4759 = shalt.err (!%p4756_p3)
}
 0x43c   : > { %s4760_s23 = scalar_lea.hbm %s5134_s22, 256  ;;  %s4764_s8 = scalar_lea.hbm %s5183_s7, 768 }
 0x43d   : > { %p4761_p12 = scmp.ne.s32.totalorder %s5134_s22, %s4760_s23  ;;  %p4765_p4 = scmp.lt.s32.totalorder %s5134_s22, %s5183_s7 }
 0x43e   : > { %p4766_p9 = scmp.lt.s32.totalorder %s4764_s8, %s4760_s23 }
 0x43f   : > { %p4762_p2 = pnand %p4761_p12, %p5206_p5 }
 0x440   : > { %p4767_p11 = por %p4766_p9, %p4765_p4 }
 0x441   : > { %p4763_p1 = pneg %p4762_p2 }
 0x443   : > { %p4768_p10 = pnand %p4767_p11, %p4763_p1 }
 0x445   : > { %4771 = shalt.err (!%p4768_p10)
}
 0x446   : > { %s4840_s10 = smov 128   ;;  %s4841_s14 = smov 8  }
 0x447   : > { %3932 = dma.vmem_to_hbm [thread:$0]  (%p5206_p5), %s5129_s28, 256, %s5134_s22, %s3289_s15, %s4840_s10, %s4840_s10, %s4841_s14  }
 0x448 PF: > { %p3974_p13 = scmp.ge.s32.totalorder %s4822_s27, 2  ;;  %s3317_s17 = sand.u32 1, %s4810_s24  }
 0x449   : > { %p5207_p0 = scmp.ne.s32.totalorder %s5196_s21, 0  ;;  %s3318_s30 = scalar_lea.sflag [#allocation4], %s3317_s17 }
 0x44b   : > { %p3958_p6 = pnand %p3974_p13, %p5207_p0 }
 0x44d   : > { %p3959_p8 = pneg %p3958_p6 }
 0x44f   : > { %4805 = dma.done.wait (%p3959_p8), %s3318_s30, 256  }
 0x450   : > { %4807 = vsyncadd (%p3959_p8), %s3318_s30, 4294967040  ;;  %p23_p7 = scmp.ge.s32.totalorder %s4980_s11, 5   ;;  %s5208_s24 = smov %s4814_s25 }
 0x451   : > { %s5209_s25 = smov %s4818_s26  ;;  %s5210_s26 = smov %s4991_s18 }
 0x452   : > { %s5211_s27 = smov %s4980_s11  ;;  %25 = sbr.rel (!%p23_p7) target bundleno = 10 (0xa), region = 117 }
 0x457   :  { %3323 = vsyncpa [#allocation3], 1 }
 0x458   :  { %3325 = vsyncpa [#allocation3 + $0x1], 1 }
 0x459   :  { %3326 = vsyncpa [#allocation6], 1 }
 0x45a   :  { %3327 = vsyncpa [#allocation9], 1 }
 0x45b   :  { %3328 = vsyncpa [#allocation12], 1 }
 0x45c   :  { %3329 = vsyncpa [#allocation4], 1 }
 0x45d   :  { %3331 = vsyncpa [#allocation4 + $0x1], 1 }

</bundles_post_ra>
